<compile_context>
chip_gen: v5e
topology: v5e:2x2
jax: 0.10.0
libtpu: 0.0.40
codegen_flags: <defaults>
</compile_context>

<pallas_src>
import functools
import math

import jax
import jax.numpy as jnp
from jax.experimental import pallas as pl
from jax.experimental.pallas import tpu as pltpu

CFG = dict(vocab_size=100, hidden=64, layers=2, heads=2,
           intermediate=128, max_pos=16, type_vocab=2)

LN_EPS = 1e-12


# --------------------------- in-kernel helpers ---------------------------

def _layernorm(x, g, b, eps):
    mean = jnp.mean(x, axis=-1, keepdims=True)
    xc = x - mean
    var = jnp.mean(xc * xc, axis=-1, keepdims=True)
    inv = jax.lax.rsqrt(var + eps)
    return xc * inv * g + b


def _gelu(x):
    # TODO(synk): HF BERT uses erf-based GELU; tanh approximation used here.
    c = math.sqrt(2.0 / math.pi)
    return 0.5 * x * (1.0 + jnp.tanh(c * (x + 0.044715 * x * x * x)))


# --------------------------- fused encoder-layer kernel ---------------------------

def _encoder_layer_kernel(x_ref, mbias_ref, emb_g_ref, emb_b_ref,
                          qkv_w_ref, qkv_b_ref, ao_w_ref, ao_b_ref,
                          a_ln_g_ref, a_ln_b_ref,
                          fi_w_ref, fi_b_ref, fo_w_ref, fo_b_ref,
                          f_ln_g_ref, f_ln_b_ref,
                          o_ref, x_vmem, *, num_heads, seq, eps):
    # grid = (batch_tiles, num_layers); this body runs one layer on one batch
    # tile, with the running activation kept in the VMEM scratch `x_vmem`.
    li = pl.program_id(1)

    @pl.when(li == 0)
    def _init():
        # Embedding LayerNorm fused into the first layer step (residual-free).
        x_vmem[...] = _layernorm(x_ref[...], emb_g_ref[...], emb_b_ref[...], eps)

    x = x_vmem[...]                      # (mt, h) = (bt*S, h)
    mt, hdim = x.shape
    dh = hdim // num_heads
    bt = mt // seq

    # ---- self-attention: fused QKV projection (lane width 3h >= 128) ----
    qkv = jnp.dot(x, qkv_w_ref[0], preferred_element_type=jnp.float32) + qkv_b_ref[0]
    bias = mbias_ref[...]                # (bt, 1, S) additive mask bias
    w_ao = ao_w_ref[0]                   # (h, h)

    # Per-head attention; head outputs are folded directly into the output
    # projection (ctx_h @ ao_w[h*dh:(h+1)*dh, :]) so no concat is needed.
    attn = jnp.zeros((mt, hdim), jnp.float32)
    for hd in range(num_heads):
        q = qkv[:, hd * dh:(hd + 1) * dh].reshape(bt, seq, dh)            # pre-scaled
        k = qkv[:, hdim + hd * dh:hdim + (hd + 1) * dh].reshape(bt, seq, dh)
        v = qkv[:, 2 * hdim + hd * dh:2 * hdim + (hd + 1) * dh].reshape(bt, seq, dh)

        s = jnp.einsum("bqd,bkd->bqk", q, k, preferred_element_type=jnp.float32)
        s = s + bias                                                       # mask
        s = s - jnp.max(s, axis=-1, keepdims=True)
        p = jnp.exp(s)
        p = p * pl.reciprocal(jnp.sum(p, axis=-1, keepdims=True), approx=True)
        ctx = jnp.einsum("bqk,bkd->bqd", p, v, preferred_element_type=jnp.float32)

        attn = attn + jnp.dot(ctx.reshape(mt, dh),
                              w_ao[hd * dh:(hd + 1) * dh, :],
                              preferred_element_type=jnp.float32)
    attn = attn + ao_b_ref[0]
    x = _layernorm(attn + x, a_ln_g_ref[0], a_ln_b_ref[0], eps)

    # ---- feed-forward ----
    mid = jnp.dot(x, fi_w_ref[0], preferred_element_type=jnp.float32) + fi_b_ref[0]
    mid = _gelu(mid)
    ffn = jnp.dot(mid, fo_w_ref[0], preferred_element_type=jnp.float32) + fo_b_ref[0]
    x = _layernorm(ffn + x, f_ln_g_ref[0], f_ln_b_ref[0], eps)

    x_vmem[...] = x

    @pl.when(li == pl.num_programs(1) - 1)
    def _finalize():
        o_ref[...] = x.astype(o_ref.dtype)


def encoder(params, x, mbias, cfg, batch_tiles):
    b2s, h = x.shape
    s = mbias.shape[-1]
    num_layers = cfg["layers"]
    inter = cfg["intermediate"]
    bt = (b2s // s) // batch_tiles
    mt = bt * s

    row_map = lambda bi, li: (bi, 0)
    lyr_map = lambda bi, li: (li, 0, 0)
    fix_map = lambda bi, li: (0, 0)

    in_specs = [
        pl.BlockSpec((mt, h), row_map),                         # embeddings
        pl.BlockSpec((bt, 1, s), lambda bi, li: (bi, 0, 0)),    # mask bias
        pl.BlockSpec((1, h), fix_map),                          # emb_ln_g
        pl.BlockSpec((1, h), fix_map),                          # emb_ln_b
        pl.BlockSpec((1, h, 3 * h), lyr_map),                   # qkv_w
        pl.BlockSpec((1, 1, 3 * h), lyr_map),                   # qkv_b
        pl.BlockSpec((1, h, h), lyr_map),                       # ao_w
        pl.BlockSpec((1, 1, h), lyr_map),                       # ao_b
        pl.BlockSpec((1, 1, h), lyr_map),                       # a_ln_g
        pl.BlockSpec((1, 1, h), lyr_map),                       # a_ln_b
        pl.BlockSpec((1, h, inter), lyr_map),                   # fi_w
        pl.BlockSpec((1, 1, inter), lyr_map),                   # fi_b
        pl.BlockSpec((1, inter, h), lyr_map),                   # fo_w
        pl.BlockSpec((1, 1, h), lyr_map),                       # fo_b
        pl.BlockSpec((1, 1, h), lyr_map),                       # f_ln_g
        pl.BlockSpec((1, 1, h), lyr_map),                       # f_ln_b
    ]

    return pl.pallas_call(
        functools.partial(_encoder_layer_kernel,
                          num_heads=cfg["heads"], seq=s, eps=LN_EPS),
        grid=(batch_tiles, num_layers),
        in_specs=in_specs,
        out_specs=pl.BlockSpec((mt, h), row_map),
        out_shape=jax.ShapeDtypeStruct((b2s, h), jnp.float32),
        scratch_shapes=[pltpu.VMEM((mt, h), jnp.float32)],
        compiler_params=pltpu.CompilerParams(
            dimension_semantics=("parallel", "arbitrary")),
    )(x, mbias, params["emb_ln_g"], params["emb_ln_b"],
      params["qkv_w"], params["qkv_b"], params["ao_w"], params["ao_b"],
      params["a_ln_g"], params["a_ln_b"], params["fi_w"], params["fi_b"],
      params["fo_w"], params["fo_b"], params["f_ln_g"], params["f_ln_b"])


# --------------------------- pooler kernel ---------------------------

def _pooler_kernel(x_ref, w_ref, b_ref, o_ref):
    acc = jnp.dot(x_ref[...], w_ref[...], preferred_element_type=jnp.float32)
    acc = acc + b_ref[...]
    o_ref[...] = jnp.tanh(acc).astype(o_ref.dtype)


def pooler(cls_tok, w, b):
    m, h = cls_tok.shape
    n = w.shape[1]
    full2 = lambda shape: pl.BlockSpec(shape, lambda i: (0, 0))
    return pl.pallas_call(
        _pooler_kernel,
        grid=(1,),
        in_specs=[full2((m, h)), full2((h, n)), full2((1, n))],
        out_specs=full2((m, n)),
        out_shape=jax.ShapeDtypeStruct((m, n), jnp.float32),
    )(cls_tok, w, b)


# --------------------------- params & forward glue ---------------------------

def init_params(key, cfg):
    h, inter, num_layers = cfg["hidden"], cfg["intermediate"], cfg["layers"]
    dh = h // cfg["heads"]
    std = 0.02

    def nrm(k, shape):
        return std * jax.random.normal(k, shape, dtype=jnp.float32)

    keys = iter(jax.random.split(key, 4 + num_layers * 6))
    scale = 1.0 / math.sqrt(dh)

    qkv_w, ao_w, fi_w, fo_w = [], [], [], []
    for _ in range(num_layers):
        qw = nrm(next(keys), (h, h)) * scale      # 1/sqrt(Dh) folded into Q proj
        kw = nrm(next(keys), (h, h))
        vw = nrm(next(keys), (h, h))
        qkv_w.append(jnp.concatenate([qw, kw, vw], axis=1))
        ao_w.append(nrm(next(keys), (h, h)))
        fi_w.append(nrm(next(keys), (h, inter)))
        fo_w.append(nrm(next(keys), (inter, h)))

    return {
        "word_emb": nrm(next(keys), (cfg["vocab_size"], h)),
        "pos_emb": nrm(next(keys), (cfg["max_pos"], h)),
        "type_emb": nrm(next(keys), (cfg["type_vocab"], h)),
        "emb_ln_g": jnp.ones((1, h), jnp.float32),
        "emb_ln_b": jnp.zeros((1, h), jnp.float32),
        "pool_w": nrm(next(keys), (h, h)),
        "pool_b": jnp.zeros((1, h), jnp.float32),
        "qkv_w": jnp.stack(qkv_w),                              # (L, h, 3h)
        "qkv_b": jnp.zeros((num_layers, 1, 3 * h), jnp.float32),  # (zero, so the Q-scale fold is a no-op here)
        "ao_w": jnp.stack(ao_w), "ao_b": jnp.zeros((num_layers, 1, h), jnp.float32),
        "a_ln_g": jnp.ones((num_layers, 1, h), jnp.float32),
        "a_ln_b": jnp.zeros((num_layers, 1, h), jnp.float32),
        "fi_w": jnp.stack(fi_w), "fi_b": jnp.zeros((num_layers, 1, inter), jnp.float32),
        "fo_w": jnp.stack(fo_w), "fo_b": jnp.zeros((num_layers, 1, h), jnp.float32),
        "f_ln_g": jnp.ones((num_layers, 1, h), jnp.float32),
        "f_ln_b": jnp.zeros((num_layers, 1, h), jnp.float32),
    }


def _pick_batch_tiles(b2, s):
    # 2-way batch split lets v7x's second TensorCore take half the work;
    # fall back to 1 if the tile would violate the (8, 128) sublane rule.
    if b2 % 2 == 0 and ((b2 // 2) * s) % 8 == 0:
        return 2
    return 1


def bert_forward(params, ids, mask, token_type_ids, cfg):
    b2, s = ids.shape
    h = cfg["hidden"]

    # Embedding gathers stay in plain JAX glue; LayerNorm is fused in-kernel.
    pos = jnp.arange(s, dtype=jnp.int32)[None, :]
    emb = (params["word_emb"][ids]
           + params["pos_emb"][pos]
           + params["type_emb"][token_type_ids])
    x = emb.reshape(b2 * s, h).astype(jnp.float32)

    # Tiny additive mask bias, broadcast to (bt, S, S) inside the kernel.
    mbias = ((1.0 - mask.astype(jnp.float32)) * -10000.0)[:, None, :]   # (B2, 1, S)

    batch_tiles = _pick_batch_tiles(b2, s)
    seq_out = encoder(params, x, mbias, cfg, batch_tiles)               # (B2*S, h)

    # Pooler: dense(tanh) on the [CLS] token -> output1[1] in HF BertModel.
    cls_tok = seq_out.reshape(b2, s, h)[:, 0, :]
    return pooler(cls_tok, params["pool_w"], params["pool_b"])          # (B2, h)


def twin_bert_forward(params, ids, mask, token_type_ids, cfg):
    # Batch both twins through one pass of the shared encoder, split at the end.
    two, b, s = ids.shape
    pooled = bert_forward(params,
                          ids.reshape(two * b, s),
                          mask.reshape(two * b, s),
                          token_type_ids.reshape(two * b, s),
                          cfg)
    return pooled[:b], pooled[b:]


# --------------------------- main ---------------------------

if __name__ == "__main__":
    key = jax.random.PRNGKey(0)
    pkey, ikey = jax.random.split(key)
    params = init_params(pkey, CFG)

    B, S = 2, 8
    ids = jax.random.randint(ikey, (2, B, S), 0, CFG["vocab_size"], dtype=jnp.int32)
    mask = jnp.ones((2, B, S), jnp.float32)
    mask = mask.at[:, :, -2:].set(0.0)            # pad last two tokens
    token_type_ids = jnp.concatenate(
        [jnp.zeros((2, B, S // 2), jnp.int32), jnp.ones((2, B, S // 2), jnp.int32)],
        axis=-1)

    fwd = jax.jit(lambda i, m, t: twin_bert_forward(params, i, m, t, CFG))
    out1, out2 = fwd(ids, mask, token_type_ids)
    jax.block_until_ready((out1, out2))
    assert out1.shape == (B, CFG["hidden"]) and out2.shape == (B, CFG["hidden"])
    print("KERNEL_OK")
</pallas_src>

<mosaic_0001>
module attributes {stable_mosaic.version = 11 : i64} {
  func.func @_pooler_kernel(%arg0: i32, %arg1: memref<4x64xf32, #tpu.memory_space<vmem>>, %arg2: memref<64x64xf32, #tpu.memory_space<vmem>>, %arg3: memref<1x64xf32, #tpu.memory_space<vmem>>, %arg4: memref<4x64xf32, #tpu.memory_space<vmem>>) attributes {dimension_semantics = [#tpu.dimension_semantics<arbitrary>], iteration_bounds = array<i64: 1>, scalar_prefetch = 0 : i64, scratch_operands = 0 : i64, tpu.core_type = #tpu.core_type<tc>, window_params = [{pipeline_mode = #tpu.pipeline_mode<synchronous>, transform_indices = @transform_0, window_bounds = array<i64: 4, 64>}, {pipeline_mode = #tpu.pipeline_mode<synchronous>, transform_indices = @transform_1, window_bounds = array<i64: 64, 64>}, {pipeline_mode = #tpu.pipeline_mode<synchronous>, transform_indices = @transform_2, window_bounds = array<i64: 1, 64>}, {pipeline_mode = #tpu.pipeline_mode<synchronous>, transform_indices = @transform_3, window_bounds = array<i64: 4, 64>}]} {
    %c0 = arith.constant 0 : index
    %c0_0 = arith.constant 0 : index
    %0 = vector.load %arg1[%c0, %c0_0] : memref<4x64xf32, #tpu.memory_space<vmem>>, vector<4x64xf32>
    %c0_1 = arith.constant 0 : index
    %c0_2 = arith.constant 0 : index
    %1 = vector.load %arg2[%c0_1, %c0_2] : memref<64x64xf32, #tpu.memory_space<vmem>>, vector<64x64xf32>
    %cst = arith.constant dense<0.000000e+00> : vector<4x64xf32>
    %2 = tpu.matmul %0, %1, %cst {dimension_numbers = #tpu.dot_dimension_numbers<[1], [0], [0], [1], [0, 0, 1, 1], [], []>} : vector<4x64xf32>, vector<64x64xf32>, vector<4x64xf32> -> vector<4x64xf32>
    %c0_3 = arith.constant 0 : index
    %c0_4 = arith.constant 0 : index
    %3 = vector.load %arg3[%c0_3, %c0_4] : memref<1x64xf32, #tpu.memory_space<vmem>>, vector<1x64xf32>
    %4 = vector.broadcast %3 : vector<1x64xf32> to vector<4x64xf32>
    %5 = arith.addf %2, %4 : vector<4x64xf32>
    %6 = math.tanh %5 : vector<4x64xf32>
    %c0_5 = arith.constant 0 : index
    %c0_6 = arith.constant 0 : index
    %7 = vector.load %arg4[%c0_5, %c0_6] : memref<4x64xf32, #tpu.memory_space<vmem>>, vector<4x64xf32>
    tpu.vector_store %arg4[%c0_5, %c0_6], %6 {strides = array<i32>} : memref<4x64xf32, #tpu.memory_space<vmem>>, vector<4x64xf32>,
    return
  }
  func.func @transform_0(%arg0: i32) -> (i32, i32) {
    %c0_i32 = arith.constant 0 : i32
    %c0_i32_0 = arith.constant 0 : i32
    %c0_i32_1 = arith.constant 0 : i32
    return %c0_i32, %c0_i32_0 : i32, i32
  }
  func.func @transform_1(%arg0: i32) -> (i32, i32) {
    %c0_i32 = arith.constant 0 : i32
    %c0_i32_0 = arith.constant 0 : i32
    %c0_i32_1 = arith.constant 0 : i32
    return %c0_i32, %c0_i32_0 : i32, i32
  }
  func.func @transform_2(%arg0: i32) -> (i32, i32) {
    %c0_i32 = arith.constant 0 : i32
    %c0_i32_0 = arith.constant 0 : i32
    %c0_i32_1 = arith.constant 0 : i32
    return %c0_i32, %c0_i32_0 : i32, i32
  }
  func.func @transform_3(%arg0: i32) -> (i32, i32) {
    %c0_i32 = arith.constant 0 : i32
    %c0_i32_0 = arith.constant 0 : i32
    %c0_i32_1 = arith.constant 0 : i32
    return %c0_i32, %c0_i32_0 : i32, i32
  }
}

module attributes {stable_mosaic.version = 11 : i64} {
  func.func @_encoder_layer_kernel(%arg0: i32, %arg1: i32, %arg2: memref<16x64xf32, #tpu.memory_space<vmem>>, %arg3: memref<2x1x8xf32, #tpu.memory_space<vmem>>, %arg4: memref<1x64xf32, #tpu.memory_space<vmem>>, %arg5: memref<1x64xf32, #tpu.memory_space<vmem>>, %arg6: memref<1x64x192xf32, #tpu.memory_space<vmem>>, %arg7: memref<1x1x192xf32, #tpu.memory_space<vmem>>, %arg8: memref<1x64x64xf32, #tpu.memory_space<vmem>>, %arg9: memref<1x1x64xf32, #tpu.memory_space<vmem>>, %arg10: memref<1x1x64xf32, #tpu.memory_space<vmem>>, %arg11: memref<1x1x64xf32, #tpu.memory_space<vmem>>, %arg12: memref<1x64x128xf32, #tpu.memory_space<vmem>>, %arg13: memref<1x1x128xf32, #tpu.memory_space<vmem>>, %arg14: memref<1x128x64xf32, #tpu.memory_space<vmem>>, %arg15: memref<1x1x64xf32, #tpu.memory_space<vmem>>, %arg16: memref<1x1x64xf32, #tpu.memory_space<vmem>>, %arg17: memref<1x1x64xf32, #tpu.memory_space<vmem>>, %arg18: memref<16x64xf32, #tpu.memory_space<vmem>>, %arg19: memref<16x64xf32, #tpu.memory_space<vmem>>) attributes {dimension_semantics = [#tpu.dimension_semantics<parallel>, #tpu.dimension_semantics<arbitrary>], iteration_bounds = array<i64: 2, 2>, scalar_prefetch = 0 : i64, scratch_operands = 1 : i64, tpu.core_type = #tpu.core_type<tc>, window_params = [{transform_indices = @transform_0, window_bounds = array<i64: 16, 64>}, {transform_indices = @transform_1, window_bounds = array<i64: 2, 1, 8>}, {pipeline_mode = #tpu.pipeline_mode<synchronous>, transform_indices = @transform_2, window_bounds = array<i64: 1, 64>}, {pipeline_mode = #tpu.pipeline_mode<synchronous>, transform_indices = @transform_3, window_bounds = array<i64: 1, 64>}, {transform_indices = @transform_4, window_bounds = array<i64: 1, 64, 192>}, {transform_indices = @transform_5, window_bounds = array<i64: 1, 1, 192>}, {transform_indices = @transform_6, window_bounds = array<i64: 1, 64, 64>}, {transform_indices = @transform_7, window_bounds = array<i64: 1, 1, 64>}, {transform_indices = @transform_8, window_bounds = array<i64: 1, 1, 64>}, {transform_indices = @transform_9, window_bounds = array<i64: 1, 1, 64>}, {transform_indices = @transform_10, window_bounds = array<i64: 1, 64, 128>}, {transform_indices = @transform_11, window_bounds = array<i64: 1, 1, 128>}, {transform_indices = @transform_12, window_bounds = array<i64: 1, 128, 64>}, {transform_indices = @transform_13, window_bounds = array<i64: 1, 1, 64>}, {transform_indices = @transform_14, window_bounds = array<i64: 1, 1, 64>}, {transform_indices = @transform_15, window_bounds = array<i64: 1, 1, 64>}, {transform_indices = @transform_16, window_bounds = array<i64: 16, 64>}]} {
    %c0_i32 = arith.constant 0 : i32
    %0 = arith.cmpi eq, %arg1, %c0_i32 : i32
    %1 = arith.extui %0 : i1 to i32
    %c0_i32_0 = arith.constant 0 : i32
    %2 = arith.cmpi ne, %1, %c0_i32_0 : i32
    scf.if %2 {
      %c0_71 = arith.constant 0 : index
      %c0_72 = arith.constant 0 : index
      %148 = vector.load %arg2[%c0_71, %c0_72] : memref<16x64xf32, #tpu.memory_space<vmem>>, vector<16x64xf32>
      %c0_73 = arith.constant 0 : index
      %c0_74 = arith.constant 0 : index
      %149 = vector.load %arg4[%c0_73, %c0_74] : memref<1x64xf32, #tpu.memory_space<vmem>>, vector<1x64xf32>
      %c0_75 = arith.constant 0 : index
      %c0_76 = arith.constant 0 : index
      %150 = vector.load %arg5[%c0_75, %c0_76] : memref<1x64xf32, #tpu.memory_space<vmem>>, vector<1x64xf32>
      %cst_77 = arith.constant dense<0.000000e+00> : vector<16xf32>
      %151 = vector.multi_reduction <add>, %148, %cst_77 [1] : vector<16x64xf32> to vector<16xf32>
      %152 = vector.shape_cast %151 : vector<16xf32> to vector<16x1xf32>
      %cst_78 = arith.constant 6.400000e+01 : f32
      %153 = vector.broadcast %cst_78 : f32 to vector<16x1xf32>
      %154 = arith.divf %152, %153 : vector<16x1xf32>
      %155 = vector.broadcast %154 : vector<16x1xf32> to vector<16x64xf32>
      %156 = arith.subf %148, %155 : vector<16x64xf32>
      %157 = arith.mulf %156, %156 : vector<16x64xf32>
      %cst_79 = arith.constant dense<0.000000e+00> : vector<16xf32>
      %158 = vector.multi_reduction <add>, %157, %cst_79 [1] : vector<16x64xf32> to vector<16xf32>
      %159 = vector.shape_cast %158 : vector<16xf32> to vector<16x1xf32>
      %cst_80 = arith.constant 6.400000e+01 : f32
      %160 = vector.broadcast %cst_80 : f32 to vector<16x1xf32>
      %161 = arith.divf %159, %160 : vector<16x1xf32>
      %cst_81 = arith.constant 9.99999996E-13 : f32
      %162 = vector.broadcast %cst_81 : f32 to vector<16x1xf32>
      %163 = arith.addf %161, %162 : vector<16x1xf32>
      %164 = math.rsqrt %163 : vector<16x1xf32>
      %165 = vector.broadcast %164 : vector<16x1xf32> to vector<16x64xf32>
      %166 = arith.mulf %156, %165 : vector<16x64xf32>
      %167 = vector.broadcast %149 : vector<1x64xf32> to vector<16x64xf32>
      %168 = arith.mulf %166, %167 : vector<16x64xf32>
      %169 = vector.broadcast %150 : vector<1x64xf32> to vector<16x64xf32>
      %170 = arith.addf %168, %169 : vector<16x64xf32>
      %c0_82 = arith.constant 0 : index
      %c0_83 = arith.constant 0 : index
      %171 = vector.load %arg19[%c0_82, %c0_83] : memref<16x64xf32, #tpu.memory_space<vmem>>, vector<16x64xf32>
      tpu.vector_store %arg19[%c0_82, %c0_83], %170 {strides = array<i32>} : memref<16x64xf32, #tpu.memory_space<vmem>>, vector<16x64xf32>,
    } else {
    }
    %c0 = arith.constant 0 : index
    %c0_1 = arith.constant 0 : index
    %3 = vector.load %arg19[%c0, %c0_1] : memref<16x64xf32, #tpu.memory_space<vmem>>, vector<16x64xf32>
    %c0_2 = arith.constant 0 : index
    %c0_3 = arith.constant 0 : index
    %c0_4 = arith.constant 0 : index
    %4 = vector.load %arg6[%c0_2, %c0_3, %c0_4] : memref<1x64x192xf32, #tpu.memory_space<vmem>>, vector<1x64x192xf32>
    %5 = vector.shape_cast %4 : vector<1x64x192xf32> to vector<64x192xf32>
    %cst = arith.constant dense<0.000000e+00> : vector<16x192xf32>
    %6 = tpu.matmul %3, %5, %cst {dimension_numbers = #tpu.dot_dimension_numbers<[1], [0], [0], [1], [0, 0, 1, 1], [], []>} : vector<16x64xf32>, vector<64x192xf32>, vector<16x192xf32> -> vector<16x192xf32>
    %c0_5 = arith.constant 0 : index
    %c0_6 = arith.constant 0 : index
    %c0_7 = arith.constant 0 : index
    %7 = vector.load %arg7[%c0_5, %c0_6, %c0_7] : memref<1x1x192xf32, #tpu.memory_space<vmem>>, vector<1x1x192xf32>
    %8 = vector.shape_cast %7 : vector<1x1x192xf32> to vector<1x192xf32>
    %9 = vector.broadcast %8 : vector<1x192xf32> to vector<16x192xf32>
    %10 = arith.addf %6, %9 : vector<16x192xf32>
    %c0_8 = arith.constant 0 : index
    %c0_9 = arith.constant 0 : index
    %c0_10 = arith.constant 0 : index
    %11 = vector.load %arg3[%c0_8, %c0_9, %c0_10] : memref<2x1x8xf32, #tpu.memory_space<vmem>>, vector<2x1x8xf32>
    %c0_11 = arith.constant 0 : index
    %c0_12 = arith.constant 0 : index
    %c0_13 = arith.constant 0 : index
    %12 = vector.load %arg8[%c0_11, %c0_12, %c0_13] : memref<1x64x64xf32, #tpu.memory_space<vmem>>, vector<1x64x64xf32>
    %13 = vector.shape_cast %12 : vector<1x64x64xf32> to vector<64x64xf32>
    %cst_14 = arith.constant 0.000000e+00 : f32
    %14 = vector.broadcast %cst_14 : f32 to vector<16x64xf32>
    %15 = vector.extract_strided_slice %10 {offsets = [0, 0], sizes = [16, 32], strides = [1, 1]} : vector<16x192xf32> to vector<16x32xf32>
    %16 = vector.shape_cast %15 : vector<16x32xf32> to vector<2x8x32xf32>
    %17 = vector.extract_strided_slice %10 {offsets = [0, 64], sizes = [16, 32], strides = [1, 1]} : vector<16x192xf32> to vector<16x32xf32>
    %18 = vector.shape_cast %17 : vector<16x32xf32> to vector<2x8x32xf32>
    %19 = vector.extract_strided_slice %10 {offsets = [0, 128], sizes = [16, 32], strides = [1, 1]} : vector<16x192xf32> to vector<16x32xf32>
    %20 = vector.shape_cast %19 : vector<16x32xf32> to vector<2x8x32xf32>
    "tpu.trace_start"() <{level = 10 : i32, message = "bqd,bkd->bqk"}> : () -> ()
    %cst_15 = arith.constant dense<0.000000e+00> : vector<2x8x8xf32>
    %21 = tpu.matmul %16, %18, %cst_15 {dimension_numbers = #tpu.dot_dimension_numbers<[2], [2], [1], [1], [0, 0, 0, 1, 1, 1], [0], [0]>} : vector<2x8x32xf32>, vector<2x8x32xf32>, vector<2x8x8xf32> -> vector<2x8x8xf32>
    "tpu.trace_stop"() : () -> ()
    %22 = vector.broadcast %11 : vector<2x1x8xf32> to vector<2x8x8xf32>
    %23 = arith.addf %21, %22 : vector<2x8x8xf32>
    %cst_16 = arith.constant dense<0xFF800000> : vector<2x8xf32>
    %24 = vector.multi_reduction <maximumf>, %23, %cst_16 [2] : vector<2x8x8xf32> to vector<2x8xf32>
    %25 = vector.shape_cast %24 : vector<2x8xf32> to vector<2x8x1xf32>
    %26 = vector.broadcast %25 : vector<2x8x1xf32> to vector<2x8x8xf32>
    %27 = arith.subf %23, %26 : vector<2x8x8xf32>
    %28 = math.exp %27 : vector<2x8x8xf32>
    %cst_17 = arith.constant dense<0.000000e+00> : vector<2x8xf32>
    %29 = vector.multi_reduction <add>, %28, %cst_17 [2] : vector<2x8x8xf32> to vector<2x8xf32>
    %30 = vector.shape_cast %29 : vector<2x8xf32> to vector<2x8x1xf32>
    %31 = tpu.reciprocal %30 {approx = true} : vector<2x8x1xf32> -> vector<2x8x1xf32>
    %32 = vector.broadcast %31 : vector<2x8x1xf32> to vector<2x8x8xf32>
    %33 = arith.mulf %28, %32 : vector<2x8x8xf32>
    "tpu.trace_start"() <{level = 10 : i32, message = "bqk,bkd->bqd"}> : () -> ()
    %cst_18 = arith.constant dense<0.000000e+00> : vector<2x8x32xf32>
    %34 = tpu.matmul %33, %20, %cst_18 {dimension_numbers = #tpu.dot_dimension_numbers<[2], [1], [1], [2], [0, 0, 0, 1, 1, 2], [0], [0]>} : vector<2x8x8xf32>, vector<2x8x32xf32>, vector<2x8x32xf32> -> vector<2x8x32xf32>
    "tpu.trace_stop"() : () -> ()
    %35 = vector.shape_cast %34 : vector<2x8x32xf32> to vector<16x32xf32>
    %36 = vector.extract_strided_slice %13 {offsets = [0, 0], sizes = [32, 64], strides = [1, 1]} : vector<64x64xf32> to vector<32x64xf32>
    %cst_19 = arith.constant dense<0.000000e+00> : vector<16x64xf32>
    %37 = tpu.matmul %35, %36, %cst_19 {dimension_numbers = #tpu.dot_dimension_numbers<[1], [0], [0], [1], [0, 0, 1, 1], [], []>} : vector<16x32xf32>, vector<32x64xf32>, vector<16x64xf32> -> vector<16x64xf32>
    %38 = arith.addf %14, %37 : vector<16x64xf32>
    %39 = vector.extract_strided_slice %10 {offsets = [0, 32], sizes = [16, 32], strides = [1, 1]} : vector<16x192xf32> to vector<16x32xf32>
    %40 = vector.shape_cast %39 : vector<16x32xf32> to vector<2x8x32xf32>
    %41 = vector.extract_strided_slice %10 {offsets = [0, 96], sizes = [16, 32], strides = [1, 1]} : vector<16x192xf32> to vector<16x32xf32>
    %42 = vector.shape_cast %41 : vector<16x32xf32> to vector<2x8x32xf32>
    %43 = vector.extract_strided_slice %10 {offsets = [0, 160], sizes = [16, 32], strides = [1, 1]} : vector<16x192xf32> to vector<16x32xf32>
    %44 = vector.shape_cast %43 : vector<16x32xf32> to vector<2x8x32xf32>
    "tpu.trace_start"() <{level = 10 : i32, message = "bqd,bkd->bqk"}> : () -> ()
    %cst_20 = arith.constant dense<0.000000e+00> : vector<2x8x8xf32>
    %45 = tpu.matmul %40, %42, %cst_20 {dimension_numbers = #tpu.dot_dimension_numbers<[2], [2], [1], [1], [0, 0, 0, 1, 1, 1], [0], [0]>} : vector<2x8x32xf32>, vector<2x8x32xf32>, vector<2x8x8xf32> -> vector<2x8x8xf32>
    "tpu.trace_stop"() : () -> ()
    %46 = vector.broadcast %11 : vector<2x1x8xf32> to vector<2x8x8xf32>
    %47 = arith.addf %45, %46 : vector<2x8x8xf32>
    %cst_21 = arith.constant dense<0xFF800000> : vector<2x8xf32>
    %48 = vector.multi_reduction <maximumf>, %47, %cst_21 [2] : vector<2x8x8xf32> to vector<2x8xf32>
    %49 = vector.shape_cast %48 : vector<2x8xf32> to vector<2x8x1xf32>
    %50 = vector.broadcast %49 : vector<2x8x1xf32> to vector<2x8x8xf32>
    %51 = arith.subf %47, %50 : vector<2x8x8xf32>
    %52 = math.exp %51 : vector<2x8x8xf32>
    %cst_22 = arith.constant dense<0.000000e+00> : vector<2x8xf32>
    %53 = vector.multi_reduction <add>, %52, %cst_22 [2] : vector<2x8x8xf32> to vector<2x8xf32>
    %54 = vector.shape_cast %53 : vector<2x8xf32> to vector<2x8x1xf32>
    %55 = tpu.reciprocal %54 {approx = true} : vector<2x8x1xf32> -> vector<2x8x1xf32>
    %56 = vector.broadcast %55 : vector<2x8x1xf32> to vector<2x8x8xf32>
    %57 = arith.mulf %52, %56 : vector<2x8x8xf32>
    "tpu.trace_start"() <{level = 10 : i32, message = "bqk,bkd->bqd"}> : () -> ()
    %cst_23 = arith.constant dense<0.000000e+00> : vector<2x8x32xf32>
    %58 = tpu.matmul %57, %44, %cst_23 {dimension_numbers = #tpu.dot_dimension_numbers<[2], [1], [1], [2], [0, 0, 0, 1, 1, 2], [0], [0]>} : vector<2x8x8xf32>, vector<2x8x32xf32>, vector<2x8x32xf32> -> vector<2x8x32xf32>
    "tpu.trace_stop"() : () -> ()
    %59 = vector.shape_cast %58 : vector<2x8x32xf32> to vector<16x32xf32>
    %60 = vector.extract_strided_slice %13 {offsets = [32, 0], sizes = [32, 64], strides = [1, 1]} : vector<64x64xf32> to vector<32x64xf32>
    %cst_24 = arith.constant dense<0.000000e+00> : vector<16x64xf32>
    %61 = tpu.matmul %59, %60, %cst_24 {dimension_numbers = #tpu.dot_dimension_numbers<[1], [0], [0], [1], [0, 0, 1, 1], [], []>} : vector<16x32xf32>, vector<32x64xf32>, vector<16x64xf32> -> vector<16x64xf32>
    %62 = arith.addf %38, %61 : vector<16x64xf32>
    %c0_25 = arith.constant 0 : index
    %c0_26 = arith.constant 0 : index
    %c0_27 = arith.constant 0 : index
    %63 = vector.load %arg9[%c0_25, %c0_26, %c0_27] : memref<1x1x64xf32, #tpu.memory_space<vmem>>, vector<1x1x64xf32>
    %64 = vector.shape_cast %63 : vector<1x1x64xf32> to vector<1x64xf32>
    %65 = vector.broadcast %64 : vector<1x64xf32> to vector<16x64xf32>
    %66 = arith.addf %62, %65 : vector<16x64xf32>
    %67 = arith.addf %66, %3 : vector<16x64xf32>
    %c0_28 = arith.constant 0 : index
    %c0_29 = arith.constant 0 : index
    %c0_30 = arith.constant 0 : index
    %68 = vector.load %arg10[%c0_28, %c0_29, %c0_30] : memref<1x1x64xf32, #tpu.memory_space<vmem>>, vector<1x1x64xf32>
    %69 = vector.shape_cast %68 : vector<1x1x64xf32> to vector<1x64xf32>
    %c0_31 = arith.constant 0 : index
    %c0_32 = arith.constant 0 : index
    %c0_33 = arith.constant 0 : index
    %70 = vector.load %arg11[%c0_31, %c0_32, %c0_33] : memref<1x1x64xf32, #tpu.memory_space<vmem>>, vector<1x1x64xf32>
    %71 = vector.shape_cast %70 : vector<1x1x64xf32> to vector<1x64xf32>
    %cst_34 = arith.constant dense<0.000000e+00> : vector<16xf32>
    %72 = vector.multi_reduction <add>, %67, %cst_34 [1] : vector<16x64xf32> to vector<16xf32>
    %73 = vector.shape_cast %72 : vector<16xf32> to vector<16x1xf32>
    %cst_35 = arith.constant 6.400000e+01 : f32
    %74 = vector.broadcast %cst_35 : f32 to vector<16x1xf32>
    %75 = arith.divf %73, %74 : vector<16x1xf32>
    %76 = vector.broadcast %75 : vector<16x1xf32> to vector<16x64xf32>
    %77 = arith.subf %67, %76 : vector<16x64xf32>
    %78 = arith.mulf %77, %77 : vector<16x64xf32>
    %cst_36 = arith.constant dense<0.000000e+00> : vector<16xf32>
    %79 = vector.multi_reduction <add>, %78, %cst_36 [1] : vector<16x64xf32> to vector<16xf32>
    %80 = vector.shape_cast %79 : vector<16xf32> to vector<16x1xf32>
    %cst_37 = arith.constant 6.400000e+01 : f32
    %81 = vector.broadcast %cst_37 : f32 to vector<16x1xf32>
    %82 = arith.divf %80, %81 : vector<16x1xf32>
    %cst_38 = arith.constant 9.99999996E-13 : f32
    %83 = vector.broadcast %cst_38 : f32 to vector<16x1xf32>
    %84 = arith.addf %82, %83 : vector<16x1xf32>
    %85 = math.rsqrt %84 : vector<16x1xf32>
    %86 = vector.broadcast %85 : vector<16x1xf32> to vector<16x64xf32>
    %87 = arith.mulf %77, %86 : vector<16x64xf32>
    %88 = vector.broadcast %69 : vector<1x64xf32> to vector<16x64xf32>
    %89 = arith.mulf %87, %88 : vector<16x64xf32>
    %90 = vector.broadcast %71 : vector<1x64xf32> to vector<16x64xf32>
    %91 = arith.addf %89, %90 : vector<16x64xf32>
    %c0_39 = arith.constant 0 : index
    %c0_40 = arith.constant 0 : index
    %c0_41 = arith.constant 0 : index
    %92 = vector.load %arg12[%c0_39, %c0_40, %c0_41] : memref<1x64x128xf32, #tpu.memory_space<vmem>>, vector<1x64x128xf32>
    %93 = vector.shape_cast %92 : vector<1x64x128xf32> to vector<64x128xf32>
    %cst_42 = arith.constant dense<0.000000e+00> : vector<16x128xf32>
    %94 = tpu.matmul %91, %93, %cst_42 {dimension_numbers = #tpu.dot_dimension_numbers<[1], [0], [0], [1], [0, 0, 1, 1], [], []>} : vector<16x64xf32>, vector<64x128xf32>, vector<16x128xf32> -> vector<16x128xf32>
    %c0_43 = arith.constant 0 : index
    %c0_44 = arith.constant 0 : index
    %c0_45 = arith.constant 0 : index
    %95 = vector.load %arg13[%c0_43, %c0_44, %c0_45] : memref<1x1x128xf32, #tpu.memory_space<vmem>>, vector<1x1x128xf32>
    %96 = vector.shape_cast %95 : vector<1x1x128xf32> to vector<1x128xf32>
    %97 = vector.broadcast %96 : vector<1x128xf32> to vector<16x128xf32>
    %98 = arith.addf %94, %97 : vector<16x128xf32>
    %cst_46 = arith.constant 5.000000e-01 : f32
    %99 = vector.broadcast %cst_46 : f32 to vector<16x128xf32>
    %100 = arith.mulf %99, %98 : vector<16x128xf32>
    %cst_47 = arith.constant 4.471500e-02 : f32
    %101 = vector.broadcast %cst_47 : f32 to vector<16x128xf32>
    %102 = arith.mulf %101, %98 : vector<16x128xf32>
    %103 = arith.mulf %102, %98 : vector<16x128xf32>
    %104 = arith.mulf %103, %98 : vector<16x128xf32>
    %105 = arith.addf %98, %104 : vector<16x128xf32>
    %cst_48 = arith.constant 0.797884583 : f32
    %106 = vector.broadcast %cst_48 : f32 to vector<16x128xf32>
    %107 = arith.mulf %106, %105 : vector<16x128xf32>
    %108 = math.tanh %107 : vector<16x128xf32>
    %cst_49 = arith.constant 1.000000e+00 : f32
    %109 = vector.broadcast %cst_49 : f32 to vector<16x128xf32>
    %110 = arith.addf %109, %108 : vector<16x128xf32>
    %111 = arith.mulf %100, %110 : vector<16x128xf32>
    %c0_50 = arith.constant 0 : index
    %c0_51 = arith.constant 0 : index
    %c0_52 = arith.constant 0 : index
    %112 = vector.load %arg14[%c0_50, %c0_51, %c0_52] : memref<1x128x64xf32, #tpu.memory_space<vmem>>, vector<1x128x64xf32>
    %113 = vector.shape_cast %112 : vector<1x128x64xf32> to vector<128x64xf32>
    %cst_53 = arith.constant dense<0.000000e+00> : vector<16x64xf32>
    %114 = tpu.matmul %111, %113, %cst_53 {dimension_numbers = #tpu.dot_dimension_numbers<[1], [0], [0], [1], [0, 0, 1, 1], [], []>} : vector<16x128xf32>, vector<128x64xf32>, vector<16x64xf32> -> vector<16x64xf32>
    %c0_54 = arith.constant 0 : index
    %c0_55 = arith.constant 0 : index
    %c0_56 = arith.constant 0 : index
    %115 = vector.load %arg15[%c0_54, %c0_55, %c0_56] : memref<1x1x64xf32, #tpu.memory_space<vmem>>, vector<1x1x64xf32>
    %116 = vector.shape_cast %115 : vector<1x1x64xf32> to vector<1x64xf32>
    %117 = vector.broadcast %116 : vector<1x64xf32> to vector<16x64xf32>
    %118 = arith.addf %114, %117 : vector<16x64xf32>
    %119 = arith.addf %118, %91 : vector<16x64xf32>
    %c0_57 = arith.constant 0 : index
    %c0_58 = arith.constant 0 : index
    %c0_59 = arith.constant 0 : index
    %120 = vector.load %arg16[%c0_57, %c0_58, %c0_59] : memref<1x1x64xf32, #tpu.memory_space<vmem>>, vector<1x1x64xf32>
    %121 = vector.shape_cast %120 : vector<1x1x64xf32> to vector<1x64xf32>
    %c0_60 = arith.constant 0 : index
    %c0_61 = arith.constant 0 : index
    %c0_62 = arith.constant 0 : index
    %122 = vector.load %arg17[%c0_60, %c0_61, %c0_62] : memref<1x1x64xf32, #tpu.memory_space<vmem>>, vector<1x1x64xf32>
    %123 = vector.shape_cast %122 : vector<1x1x64xf32> to vector<1x64xf32>
    %cst_63 = arith.constant dense<0.000000e+00> : vector<16xf32>
    %124 = vector.multi_reduction <add>, %119, %cst_63 [1] : vector<16x64xf32> to vector<16xf32>
    %125 = vector.shape_cast %124 : vector<16xf32> to vector<16x1xf32>
    %cst_64 = arith.constant 6.400000e+01 : f32
    %126 = vector.broadcast %cst_64 : f32 to vector<16x1xf32>
    %127 = arith.divf %125, %126 : vector<16x1xf32>
    %128 = vector.broadcast %127 : vector<16x1xf32> to vector<16x64xf32>
    %129 = arith.subf %119, %128 : vector<16x64xf32>
    %130 = arith.mulf %129, %129 : vector<16x64xf32>
    %cst_65 = arith.constant dense<0.000000e+00> : vector<16xf32>
    %131 = vector.multi_reduction <add>, %130, %cst_65 [1] : vector<16x64xf32> to vector<16xf32>
    %132 = vector.shape_cast %131 : vector<16xf32> to vector<16x1xf32>
    %cst_66 = arith.constant 6.400000e+01 : f32
    %133 = vector.broadcast %cst_66 : f32 to vector<16x1xf32>
    %134 = arith.divf %132, %133 : vector<16x1xf32>
    %cst_67 = arith.constant 9.99999996E-13 : f32
    %135 = vector.broadcast %cst_67 : f32 to vector<16x1xf32>
    %136 = arith.addf %134, %135 : vector<16x1xf32>
    %137 = math.rsqrt %136 : vector<16x1xf32>
    %138 = vector.broadcast %137 : vector<16x1xf32> to vector<16x64xf32>
    %139 = arith.mulf %129, %138 : vector<16x64xf32>
    %140 = vector.broadcast %121 : vector<1x64xf32> to vector<16x64xf32>
    %141 = arith.mulf %139, %140 : vector<16x64xf32>
    %142 = vector.broadcast %123 : vector<1x64xf32> to vector<16x64xf32>
    %143 = arith.addf %141, %142 : vector<16x64xf32>
    %c0_68 = arith.constant 0 : index
    %c0_69 = arith.constant 0 : index
    %144 = vector.load %arg19[%c0_68, %c0_69] : memref<16x64xf32, #tpu.memory_space<vmem>>, vector<16x64xf32>
    tpu.vector_store %arg19[%c0_68, %c0_69], %143 {strides = array<i32>} : memref<16x64xf32, #tpu.memory_space<vmem>>, vector<16x64xf32>,
    %c1_i32 = arith.constant 1 : i32
    %145 = arith.cmpi eq, %arg1, %c1_i32 : i32
    %146 = arith.extui %145 : i1 to i32
    %c0_i32_70 = arith.constant 0 : i32
    %147 = arith.cmpi ne, %146, %c0_i32_70 : i32
    scf.if %147 {
      %c0_71 = arith.constant 0 : index
      %c0_72 = arith.constant 0 : index
      %148 = vector.load %arg18[%c0_71, %c0_72] : memref<16x64xf32, #tpu.memory_space<vmem>>, vector<16x64xf32>
      tpu.vector_store %arg18[%c0_71, %c0_72], %143 {strides = array<i32>} : memref<16x64xf32, #tpu.memory_space<vmem>>, vector<16x64xf32>,
    } else {
    }
    return
  }
  func.func @transform_0(%arg0: i32, %arg1: i32) -> (i32, i32) {
    %c0_i32 = arith.constant 0 : i32
    %c0_i32_0 = arith.constant 0 : i32
    return %arg0, %c0_i32 : i32, i32
  }
  func.func @transform_1(%arg0: i32, %arg1: i32) -> (i32, i32, i32) {
    %c0_i32 = arith.constant 0 : i32
    %c0_i32_0 = arith.constant 0 : i32
    %c0_i32_1 = arith.constant 0 : i32
    return %arg0, %c0_i32, %c0_i32_0 : i32, i32, i32
  }
  func.func @transform_2(%arg0: i32, %arg1: i32) -> (i32, i32) {
    %c0_i32 = arith.constant 0 : i32
    %c0_i32_0 = arith.constant 0 : i32
    %c0_i32_1 = arith.constant 0 : i32
    return %c0_i32, %c0_i32_0 : i32, i32
  }
  func.func @transform_3(%arg0: i32, %arg1: i32) -> (i32, i32) {
    %c0_i32 = arith.constant 0 : i32
    %c0_i32_0 = arith.constant 0 : i32
    %c0_i32_1 = arith.constant 0 : i32
    return %c0_i32, %c0_i32_0 : i32, i32
  }
  func.func @transform_4(%arg0: i32, %arg1: i32) -> (i32, i32, i32) {
    %c0_i32 = arith.constant 0 : i32
    %c0_i32_0 = arith.constant 0 : i32
    %c0_i32_1 = arith.constant 0 : i32
    return %arg1, %c0_i32, %c0_i32_0 : i32, i32, i32
  }
  func.func @transform_5(%arg0: i32, %arg1: i32) -> (i32, i32, i32) {
    %c0_i32 = arith.constant 0 : i32
    %c0_i32_0 = arith.constant 0 : i32
    %c0_i32_1 = arith.constant 0 : i32
    return %arg1, %c0_i32, %c0_i32_0 : i32, i32, i32
  }
  func.func @transform_6(%arg0: i32, %arg1: i32) -> (i32, i32, i32) {
    %c0_i32 = arith.constant 0 : i32
    %c0_i32_0 = arith.constant 0 : i32
    %c0_i32_1 = arith.constant 0 : i32
    return %arg1, %c0_i32, %c0_i32_0 : i32, i32, i32
  }
  func.func @transform_7(%arg0: i32, %arg1: i32) -> (i32, i32, i32) {
    %c0_i32 = arith.constant 0 : i32
    %c0_i32_0 = arith.constant 0 : i32
    %c0_i32_1 = arith.constant 0 : i32
    return %arg1, %c0_i32, %c0_i32_0 : i32, i32, i32
  }
  func.func @transform_8(%arg0: i32, %arg1: i32) -> (i32, i32, i32) {
    %c0_i32 = arith.constant 0 : i32
    %c0_i32_0 = arith.constant 0 : i32
    %c0_i32_1 = arith.constant 0 : i32
    return %arg1, %c0_i32, %c0_i32_0 : i32, i32, i32
  }
  func.func @transform_9(%arg0: i32, %arg1: i32) -> (i32, i32, i32) {
    %c0_i32 = arith.constant 0 : i32
    %c0_i32_0 = arith.constant 0 : i32
    %c0_i32_1 = arith.constant 0 : i32
    return %arg1, %c0_i32, %c0_i32_0 : i32, i32, i32
  }
  func.func @transform_10(%arg0: i32, %arg1: i32) -> (i32, i32, i32) {
    %c0_i32 = arith.constant 0 : i32
    %c0_i32_0 = arith.constant 0 : i32
    %c0_i32_1 = arith.constant 0 : i32
    return %arg1, %c0_i32, %c0_i32_0 : i32, i32, i32
  }
  func.func @transform_11(%arg0: i32, %arg1: i32) -> (i32, i32, i32) {
    %c0_i32 = arith.constant 0 : i32
    %c0_i32_0 = arith.constant 0 : i32
    %c0_i32_1 = arith.constant 0 : i32
    return %arg1, %c0_i32, %c0_i32_0 : i32, i32, i32
  }
  func.func @transform_12(%arg0: i32, %arg1: i32) -> (i32, i32, i32) {
    %c0_i32 = arith.constant 0 : i32
    %c0_i32_0 = arith.constant 0 : i32
    %c0_i32_1 = arith.constant 0 : i32
    return %arg1, %c0_i32, %c0_i32_0 : i32, i32, i32
  }
  func.func @transform_13(%arg0: i32, %arg1: i32) -> (i32, i32, i32) {
    %c0_i32 = arith.constant 0 : i32
    %c0_i32_0 = arith.constant 0 : i32
    %c0_i32_1 = arith.constant 0 : i32
    return %arg1, %c0_i32, %c0_i32_0 : i32, i32, i32
  }
  func.func @transform_14(%arg0: i32, %arg1: i32) -> (i32, i32, i32) {
    %c0_i32 = arith.constant 0 : i32
    %c0_i32_0 = arith.constant 0 : i32
    %c0_i32_1 = arith.constant 0 : i32
    return %arg1, %c0_i32, %c0_i32_0 : i32, i32, i32
  }
  func.func @transform_15(%arg0: i32, %arg1: i32) -> (i32, i32, i32) {
    %c0_i32 = arith.constant 0 : i32
    %c0_i32_0 = arith.constant 0 : i32
    %c0_i32_1 = arith.constant 0 : i32
    return %arg1, %c0_i32, %c0_i32_0 : i32, i32, i32
  }
  func.func @transform_16(%arg0: i32, %arg1: i32) -> (i32, i32) {
    %c0_i32 = arith.constant 0 : i32
    %c0_i32_0 = arith.constant 0 : i32
    return %arg0, %c0_i32 : i32, i32
  }
}

</mosaic_0001>

<bundles_post_ra>
// kernel: _lambda_.3
= control target key start
LH: loop header
LB: loop body
LE: loop exit
PB: predicated region body
PF: predicated region fallthrough
CT: control target
= control target key end

     0   :  { %vm27_vm0 = vcmask 523264   ;;  %vm52_vm1 = vcmask 519168   ;;  %s115_s1 = inlined_call_operand.vmem [shape: f32[64,64], index: 1, kind: input, shape index: {}]   ;;  %s116_s2 = inlined_call_operand.vmem [shape: f32[1,64], index: 2, kind: input, shape index: {}]   ;;  %s117_s0 = inlined_call_operand.vmem [shape: f32[4,64], index: 0, kind: input, shape index: {}]   ;;  %s118_s3 = inlined_call_operand.vmem [shape: f32[4,64], index: 3, kind: output, shape index: {}]  }
   0x1   :  { %v22_v0 = vld [vmem:[%s115_s1 + $0x38] sm:$0xff]  ;;  %v21_v1 = vld [vmem:[%s115_s1 + $0x30] sm:$0xff]  ;;  %v20_v2 = vld [vmem:[%s115_s1 + $0x28] sm:$0xff] }
   0x2   :  { %39 = vmatpush.msra.mxu0 %v22_v0  ;;  %v19_v3 = vld [vmem:[%s115_s1 + $0x20] sm:$0xff]  ;;  %v18_v4 = vld [vmem:[%s115_s1 + $0x18] sm:$0xff]  ;;  %v17_v5 = vld [vmem:[%s115_s1 + $0x10] sm:$0xff] }
   0x3   :  { %v16_v6 = vld [vmem:[%s115_s1 + $0x8] sm:$0xff]  ;;  %v15_v7 = vld [vmem:[%s115_s1] sm:$0xff] }
   0x4   :  { %40 = vmatpush.msra.mxu0 %v21_v1  ;;  %v14_v8 = vld [vmem:[%s117_s0] sm:$0xf] }
   0x5   :  { %v59_v9 = vld [vmem:[%s116_s2] ss:$0 sm:$0xff] }
   0x6   :  { %41 = vmatpush.msra.mxu0 %v20_v2 }
   0x8   :  { %42 = vmatpush.msra.mxu0 %v19_v3 }
   0xa   :  { %43 = vmatpush.msra.mxu0 %v18_v4 }
   0xc   :  { %44 = vmatpush.msra.mxu0 %v17_v5 }
   0xe   :  { %45 = vmatpush.msra.mxu0 %v16_v6 }
  0x10   :  { %46 = vmatpush.msra.mxu0 %v15_v7 }
  0x11   :  { %58 = vmatmul.msk.f32.vlgmr.msra.gmra.mxu0 %vm27_vm0, %v14_v8 }
  0x8e   :  { %v48_v10 = vpop.f32.mrf.mxu0 }
  0x8f   :  { %v49_v11 = vadd.f32 %v59_v9, %v48_v10 }
  0x91   :  { %60 = vtanh.f32 %v49_v11 }
  0x97   :  { %v61_v12 = vpop.eup %60 }
  0x98   :  { %53 = vst.msk [vmem:[%s118_s3] sm:$0xf] %vm52_vm1, %v61_v12 }

// kernel: _lambda_.2
= control target key start
LH: loop header
LB: loop body
LE: loop exit
PB: predicated region body
PF: predicated region fallthrough
CT: control target
= control target key end

     0   :  { %s2438_s0 = inlined_call_operand.vmem [shape: f32[32,64], index: 0, kind: input, shape index: {}]   ;;  %s2439_s1 = inlined_call_operand.vmem [shape: f32[4,1,8], index: 1, kind: input, shape index: {}]   ;;  %s2440_s2 = inlined_call_operand.vmem [shape: f32[1,64], index: 2, kind: input, shape index: {}]   ;;  %s2441_s3 = inlined_call_operand.vmem [shape: f32[1,64], index: 3, kind: input, shape index: {}]   ;;  %s2442_s4 = inlined_call_operand.vmem [shape: f32[2,64,192], index: 4, kind: input, shape index: {}]   ;;  %s2443_s5 = inlined_call_operand.vmem [shape: f32[2,1,192], index: 5, kind: input, shape index: {}]   ;;  %s2444_s6 = inlined_call_operand.vmem [shape: f32[2,64,64], index: 6, kind: input, shape index: {}]   ;;  %s2445_s7 = inlined_call_operand.vmem [shape: f32[2,1,64], index: 7, kind: input, shape index: {}, may-alias: {7,9,13,15}]   ;;  %s2446_s8 = inlined_call_operand.vmem [shape: f32[2,1,64], index: 8, kind: input, shape index: {}, may-alias: {8,14}]   ;;  %s2447_s9 = inlined_call_operand.vmem [shape: f32[2,1,64], index: 9, kind: input, shape index: {}, may-alias: {7,9,13,15}]   ;;  %s2448_s10 = inlined_call_operand.hbm [shape: f32[2,64,128], index: 10, kind: input, shape index: {}]   ;;  %s2449_s11 = inlined_call_operand.vmem [shape: f32[2,1,128], index: 11, kind: input, shape index: {}]   ;;  %s2450_s12 = inlined_call_operand.vmem [shape: f32[2,128,64], index: 12, kind: input, shape index: {}]   ;;  %s2451_s13 = inlined_call_operand.vmem [shape: f32[2,1,64], index: 13, kind: input, shape index: {}, may-alias: {7,9,13,15}]   ;;  %s2452_s14 = inlined_call_operand.vmem [shape: f32[2,1,64], index: 14, kind: input, shape index: {}, may-alias: {8,14}]   ;;  %s2453_s15 = inlined_call_operand.vmem [shape: f32[2,1,64], index: 15, kind: input, shape index: {}, may-alias: {7,9,13,15}]   ;;  %s2454_s16 = inlined_call_operand.vmem [shape: f32[32,64], index: 16, kind: output, shape index: {}]  }
   0x1   :  { %2462 = sst [smem:[#allocation15_spill]] %s2438_s0 }
   0x2   :  { %2463 = sst [smem:[#allocation16_spill]] %s2439_s1 }
   0x3   :  { %2464 = sst [smem:[#allocation17_spill]] %s2440_s2 }
   0x4   :  { %2465 = sst [smem:[#allocation18_spill]] %s2441_s3 }
   0x5   :  { %2466 = sst [smem:[#allocation19_spill]] %s2442_s4 }
   0x6   :  { %2467 = sst [smem:[#allocation20_spill]] %s2443_s5 }
   0x7   :  { %2468 = sst [smem:[#allocation21_spill]] %s2444_s6 }
   0x8   :  { %2469 = sst [smem:[#allocation22_spill]] %s2446_s8 }
   0x9   :  { %2470 = sst [smem:[#allocation23_spill]] %s2447_s9 }
   0xa   :  { %2471 = sst [smem:[#allocation24_spill]] %s2448_s10 }
   0xb   :  { %2472 = sst [smem:[#allocation25_spill]] %s2451_s13 }
   0xc   :  { %2473 = sst [smem:[#allocation26_spill]] %s2452_s14 }
   0xd   :  { %2474 = sst [smem:[#allocation27_spill]] %s2453_s15 }
   0xe   :  { %2475 = sst [smem:[#allocation28_spill]] %s2454_s16 }
   0xf   :  { %21 = vsyncpa [#allocation4], 0 }
  0x10   :  { %23 = vsyncpa [#allocation4 + $0x1], 0  ;;  %s2068_s21 = smov 0   ;;  %s2070_s22 = smov 0  }
  0x11   :  { %s2072_s23 = smov 0   ;;  %s2074_s24 = smov 0  }
  0x12   :  { %s2076_s25 = smov 0   ;;  %s2078_s26 = smov 0  }
  0x13   :  { %s2080_s27 = smov 0   ;;  %s2082_s28 = smov 0  }
  0x14 LB: > { %2476 = sst [smem:[#allocation6_spill]] %s1950_s22  ;;  %s1702_s29 = sadd.s32 4294967295, %s1974_s28   ;;  %s1974_s28 = sphi %s2082_s28, %s29_s28   ;;  %s1970_s27 = sphi %s2080_s27, %s2518_s27   ;;  %s1966_s26 = sphi %s2078_s26, %s2517_s26   ;;  %s1962_s25 = sphi %s2076_s25, %s2516_s25   ;;  %s1958_s24 = sphi %s2074_s24, %s2515_s24   ;;  %s1954_s23 = sphi %s2072_s23, %s2514_s23   ;;  %s1950_s22 = sphi %s2070_s22, %s2513_s22   ;;  %s1946_s21 = sphi %s2068_s21, %s2512_s21  }
  0x15   : > { %2477 = sst [smem:[#allocation7_spill]] %s1954_s23  ;;  %s38_s30 = sadd.s32 1, %s1966_s26 }
  0x16   : > { %2478 = sst [smem:[#allocation8_spill]] %s1966_s26  ;;  %p39_p0 = scmp.ge.s32.totalorder %s38_s30, 2 }
  0x17   : > { %2479 = sst [smem:[#allocation9_spill]] %s1970_s27  ;;  %s41_s0 = sadd.s32 1, %s1970_s27 }
  0x18   : > { %2480 = sst [smem:[#allocation10_spill]] %s1974_s28  ;;  %s298_s17 = sadd.s32 1, %s1954_s23 }
  0x19   : > { %p305_p1 = scmp.ne.s32.totalorder %s1954_s23, %s1950_s22  ;;  %s2520_s30 = smov (%p39_p0, %s38_s30), 0 }
  0x1a   : > { %2481 = sst [smem:[#allocation11_spill]] %s2520_s30  ;;  %s2522_s0 = smov (!%p39_p0, %s41_s0), %s1970_s27 }
  0x1b   : > { %s295_s18 = ssub.s32 %s1966_s26, %s2520_s30  ;;  %p306_p2 = scmp.eq.s32.totalorder %s1974_s28, 0 }
  0x1c   : > { %p43_p3 = scmp.ge.s32.totalorder %s2522_s0, 2  ;;  %p296_p4 = scmp.eq.s32.totalorder %s295_s18, 0 }
  0x1d   : > { %p2118_p5 = por %p306_p2, %p305_p1  ;;  %p311_p6 = scmp.ne.s32.totalorder %s1950_s22, %s1946_s21 }
  0x1e   : > { %s2524_s0 = smov (%p43_p3, %s2522_s0), 0  ;;  %p312_p7 = scmp.eq.s32.totalorder %s1702_s29, 0 }
  0x1f   : > { %2483 = sst [smem:[#allocation12_spill]] %s2524_s0  ;;  %p1759_p8 = scmp.lt.s32.totalorder %s1974_s28, 4 }
  0x20   : > { %s2126_s20 = scalar_select %p296_p4, %s1954_s23, %s298_s17  }
  0x21   : > { %s555_s3 = sand.u32 1, %s1954_s23   ;;  %p2130_p9 = por %p312_p7, %p311_p6 }
  0x22   : > { %2484 = sst [smem:[#allocation13_spill]] %s2126_s20  ;;  %s1706_s18 = sshll.u32 %s555_s3, 6 }
  0x23   : > { %s1749_s27 = sshll.u32 %s1966_s26, 6  ;;  %s2486_s10 = sld [smem:[#allocation24_spill]] }
  0x24   : > { %s559_s14 = scalar_lea.vmem [#allocation3], %s1706_s18  ;;  %p1756_p10 = pnand %p1759_p8, %p2118_p5 }
  0x25   : > { %s567_s13 = sshll.u32 %s559_s14, 4  ;;  %p1709_p11 = scmp.ge.s32.totalorder %s1974_s28, 1  ;;  %s568_s13 = int_to_ptr.vmem [resolvable:$true] %s567_s13 }
  0x26   : > { %p607_p12 = scmp.lt.s32.totalorder %s1974_s28, 5  ;;  %s556_s29 = scalar_lea.sflag [#allocation4], %s555_s3 }
  0x27   : > { %s1976_s17 = smov 128   ;;  %s1977_s0 = smov 8  }
  0x28   : > { %p608_p13 = pnand %p1709_p11, %p607_p12 }
  0x29   : > { %s564_s15 = scalar_lea.hbm %s2486_s10, %s1749_s27 }
  0x2a   : > { %s565_s21 = sshll.u32 %s564_s15, 4  ;;  %611 = sbr.rel (%p608_p13) target bundleno = 2518 (0x9d6), region = 84  ;;  %s566_s21 = int_to_ptr.hbm [resolvable:$true] %s565_s21 }
  0x2b   : > { %1758 = dma.hbm_to_vmem [thread:$0]  (!%p1756_p10), %s566_s21, 1024, %s568_s13, %s556_s29, %s1976_s17, %s1976_s17, %s1977_s0  }
  0x2f   : > { %s613_s26 = sand.u32 1, %s1950_s22  }
  0x30   : > { %s1710_s2 = sshll.u32 %s613_s26, 6  ;;  %s614_s16 = scalar_lea.sflag [#allocation4], %s613_s26 }
  0x31   : > { %s2143_s15 = scalar_lea.vmem [#allocation3], %s1710_s2 }
  0x32   : > { %2487 = sst [smem:[#allocation14_spill]] %s2143_s15 }
  0x33   : > { %1941 = dma.done.wait (%p2130_p9), %s614_s16, 1024  }
  0x34   : > { %1943 = vsyncadd (%p2130_p9), %s614_s16, 4294966272  ;;  %s1711_s3 = sshll.u32 %s1962_s25, 1  ;;  %p727_p0 = scmp.lt.s32.totalorder %s1958_s24, 1 }
  0x35   : > { %p717_p1 = scmp.lt.s32.totalorder %s1711_s3, 3  ;;  %s2488_s1 = sld [smem:[#allocation16_spill]] }
  0x36   : > { %s2152_s13 = scalar_select %p727_p0, %s1958_s24, 1 }
  0x37   : > { %s2526_s3 = smov (!%p717_p1, %s1711_s3), 3  ;;  %s2489_s21 = sld [smem:[#allocation15_spill]] }
  0x38   : > { %s1750_s14 = sshll.u32 %s2152_s13, 7  ;;  %s1716_s26 = sshll.u32 %s2152_s13, 1 }
  0x39   : > { %s1712_s27 = sshll.u32 %s2526_s3, 3  ;;  %s2490_s4 = sld [smem:[#allocation19_spill]] }
  0x3a   : > { %s2491_s5 = sld [smem:[#allocation20_spill]]  ;;  %s1751_s22 = sshll.u32 %s2152_s13, 6 }
  0x3b   : > { %s2159_s0 = scalar_lea.vmem %s2488_s1, %s2526_s3  ;;  %s2492_s6 = sld [smem:[#allocation21_spill]] }
  0x3c   : > { %s2495_s25 = sld [smem:[#allocation25_spill]]  ;;  %p1723_p2 = scmp.ne.s32.totalorder %s1958_s24, 0 }
  0x3d   : > { %s720_s29 = scalar_lea.vmem %s2489_s21, %s1712_s27  ;;  %s2496_s21 = sld [smem:[#allocation26_spill]] }
  0x3e   : > { %s2497_s2 = sld [smem:[#allocation27_spill]] }
  0x3f   : > { %s2167_s16 = scalar_lea.vmem %s2490_s4, %s1750_s14  ;;  %s2499_s8 = sld [smem:[#allocation17_spill]] (!%p1723_p2) }
  0x40   : > { %s2172_s23 = scalar_lea.vmem %s2491_s5, %s1716_s26  ;;  %s2498_s26 = sld [smem:[#allocation28_spill]] }
  0x41   : > { %s2178_s3 = scalar_lea.vmem %s2492_s6, %s1751_s22  ;;  %s2199_s22 = scalar_lea.vmem %s2450_s12, %s1750_s14 }
  0x42   : > { %s760_s19 = scalar_lea.vmem %s2495_s25, %s2152_s13  ;;  %776 = sbr.rel (%p1723_p2) target bundleno = 349 (0x15d), region = 92 }
  0x43   : > { %s763_s17 = scalar_lea.vmem %s2496_s21, %s2152_s13 }
  0x44   : > { %s766_s10 = scalar_lea.vmem %s2497_s2, %s2152_s13 }
  0x46   : > { %s2216_s4 = scalar_lea.vmem %s2498_s26, %s1712_s27  ;;  %s2500_s27 = sld [smem:[#allocation18_spill]] (!%p1723_p2) }
  0x47   : > { %v777_v0 = vld [vmem:[%s720_s29] sm:$0xff]  ;;  %vm781_vm0 = vcmask 523264   ;;  %v778_v2 = vld [vmem:[%s720_s29 + $0x8] sm:$0xff]  ;;  %v1978_v4 = vmov 64.0  }
  0x48   : > { %v782_v1 = vsel %vm781_vm0, %v777_v0, 0.0  ;;  %v785_v3 = vsel %vm781_vm0, %v778_v2, 0.0  ;;  %1833 = vrcp.f32 %v1978_v4  ;;  %v1831_v35 = vld [vmem:[%s2499_s8] ss:$0 sm:$0xff] }
  0x49   : > { %783 = vadd.xlane.f32.xlu0 %v782_v1 }
  0x4c   : > { %v1832_v38 = vld [vmem:[%s2500_s27] ss:$0 sm:$0xff] }
  0x4e   : > { %v1834_v5 = vpop.eup %1833 }
  0x4f   : > { %v789_v6 = vmul.f32 64.0, %v1834_v5  ;;  %vm793_vm1 = vweird.f32 %v1834_v5 }
  0x51   : > { %786 = vadd.xlane.f32.xlu0 %v785_v3  ;;  %v790_v7 = vsub.f32 1.0, %v789_v6 }
  0x53   : > { %v791_v8 = vmul.f32 %v1834_v5, %v790_v7 }
  0x55   : > { %v792_v9 = vadd.f32 %v1834_v5, %v791_v8 }
  0x57   : > { %v794_v10 = vsel %vm793_vm1, %v1834_v5, %v792_v9 }
  0xbc   : > { %v784_v11 = vpop.xlane.xlu0 %783 }
  0xbd   : > { %v795_v12 = vmul.f32 %v794_v10, %v784_v11 }
  0xbf   : > { %v797_v13 = vsub.f32 %v777_v0, %v795_v12 }
  0xc1   : > { %v799_v14 = vmul.f32 %v797_v13, %v797_v13 }
  0xc3   : > { %v801_v15 = vsel %vm781_vm0, %v799_v14, 0.0 }
  0xc4   : > { %802 = vadd.xlane.f32.xlu1 %v801_v15  ;;  %v787_v16 = vpop.xlane.xlu0 %786 }
  0xc5   : > { %v796_v17 = vmul.f32 %v794_v10, %v787_v16 }
  0xc7   : > { %v798_v18 = vsub.f32 %v778_v2, %v796_v17 }
  0xc9   : > { %v800_v19 = vmul.f32 %v798_v18, %v798_v18 }
  0xcb   : > { %v804_v20 = vsel %vm781_vm0, %v800_v19, 0.0 }
  0xcc   : > { %805 = vadd.xlane.f32.xlu1 %v804_v20 }
 0x137   : > { %v803_v21 = vpop.xlane.xlu1 %802 }
 0x138   : > { %v807_v22 = vmul.f32 %v803_v21, %v794_v10 }
 0x13a   : > { %v809_v23 = vadd.f32 1e-12, %v807_v22 }
 0x13c   : > { %1835 = vrsqrt.f32 %v809_v23  ;;  %vm817_vm3 = vweird.f32 %v809_v23 }
 0x13f   : > { %v806_v24 = vpop.xlane.xlu1 %805 }
 0x140   : > { %v808_v25 = vmul.f32 %v806_v24, %v794_v10 }
 0x142   : > { %v1836_v26 = vpop.eup %1835  ;;  %v810_v27 = vadd.f32 1e-12, %v808_v25 }
 0x143   : > { %v812_v28 = vmul.f32 %v1836_v26, %v809_v23  ;;  %vm818_vm2 = vweird.f32 %v1836_v26 }
 0x144   : > { %1837 = vrsqrt.f32 %v810_v27  ;;  %vm819_vm4 = vmor %vm817_vm3, %vm818_vm2  ;;  %vm827_vm6 = vweird.f32 %v810_v27 }
 0x145   : > { %v813_v29 = vmul.f32 %v1836_v26, %v812_v28 }
 0x147   : > { %v814_v30 = vmul.f32 0.5, %v813_v29 }
 0x149   : > { %v815_v31 = vsub.f32 1.5, %v814_v30 }
 0x14a   : > { %v1838_v32 = vpop.eup %1837 }
 0x14b   : > { %v816_v33 = vmul.f32 %v1836_v26, %v815_v31  ;;  %v822_v34 = vmul.f32 %v1838_v32, %v810_v27  ;;  %vm828_vm5 = vweird.f32 %v1838_v32 }
 0x14c   : > { %vm829_vm7 = vmor %vm827_vm6, %vm828_vm5 }
 0x14d   : > { %v820_v36 = vsel %vm819_vm4, %v1836_v26, %v816_v33  ;;  %v823_v37 = vmul.f32 %v1838_v32, %v822_v34 }
 0x14e   : > { %v831_v39 = vmul.f32 %v820_v36, %v797_v13 }
 0x14f   : > { %v824_v40 = vmul.f32 0.5, %v823_v37 }
 0x150   : > { %v836_v41 = vmul.f32 %v1831_v35, %v831_v39 }
 0x151   : > { %v825_v42 = vsub.f32 1.5, %v824_v40 }
 0x152   : > { %v841_v43 = vadd.f32 %v1832_v38, %v836_v41 }
 0x153   : > { %v826_v44 = vmul.f32 %v1838_v32, %v825_v42 }
 0x154   : > { %843 = vst.msk [vmem:[#allocation2] sm:$0xff] %vm781_vm0, %v841_v43 }
 0x155   : > { %v830_v45 = vsel %vm829_vm7, %v1838_v32, %v826_v44 }
 0x156   : > { %v832_v46 = vmul.f32 %v830_v45, %v798_v18 }
 0x158   : > { %v837_v47 = vmul.f32 %v1831_v35, %v832_v46 }
 0x15a   : > { %v842_v48 = vadd.f32 %v1832_v38, %v837_v47 }
 0x15c   : > { %844 = vst.msk [vmem:[#allocation2 + $0x8] sm:$0xff] %vm781_vm0, %v842_v48 }
 0x15d PF: > { %v861_v49 = vld [vmem:[%s2167_s16 + $0x70] sm:$0xff]  ;;  %v859_v50 = vld [vmem:[%s2167_s16 + $0x60] sm:$0xff]  ;;  %vm869_vm8 = vcmask 523264   ;;  %s1979_s29 = smov 96   ;;  %s1980_s28 = smov 64   ;;  %v862_v1 = vld [vmem:[%s2167_s16 + $0x78] sm:$0xff] }
 0x15e   : > { %884 = vmatpush.msra.mxu0 %v861_v49  ;;  %v857_v51 = vld [vmem:[%s2167_s16 + $0x50] sm:$0xff]  ;;  %v855_v52 = vld [vmem:[%s2167_s16 + $0x40] sm:$0xff]  ;;  %s1981_s15 = smov 32   ;;  %v860_v2 = vld [vmem:[%s2167_s16 + $0x68] sm:$0xff]  ;;  %907 = vmatpush.msra.mxu1 %v862_v1  ;;  %vm941_vm9 = vcmask 261120   ;;  %vm993_vm10 = vcmask 64512   ;;  %s2507_s8 = scalar_lea.vmem %s2449_s11, %s2152_s13 }
 0x15f   : > { %v853_v53 = vld [vmem:[%s2167_s16 + $0x30] sm:$0xff]  ;;  %v851_v54 = vld [vmem:[%s2167_s16 + $0x20] sm:$0xff]  ;;  %v858_v3 = vld [vmem:[%s2167_s16 + $0x58] sm:$0xff]  ;;  %s2503_s18 = sld [smem:[#allocation22_spill]]  ;;  %p1746_p3 = scmp.ne.s32.totalorder %s1958_s24, 1 }
 0x160   : > { %885 = vmatpush.msra.mxu0 %v859_v50  ;;  %v849_v55 = vld [vmem:[%s2167_s16 + $0x10] sm:$0xff]  ;;  %v847_v56 = vld [vmem:[%s2167_s16] sm:$0xff]  ;;  %908 = vmatpush.msra.mxu1 %v860_v2  ;;  %v856_v5 = vld [vmem:[%s2167_s16 + $0x48] sm:$0xff]  ;;  %s2505_s20 = sld [smem:[#allocation23_spill]] }
 0x161   : > { %v2239_v57 = vld [vmem:[#allocation2] sm:$0xff]  ;;  %v854_v6 = vld [vmem:[%s2167_s16 + $0x38] sm:$0xff]  ;;  %v852_v9 = vld [vmem:[%s2167_s16 + $0x28] sm:$0xff] }
 0x162   : > { %886 = vmatpush.msra.mxu0 %v857_v51  ;;  %v863_v59 = vld [vmem:[%s2172_s23] sm:$0x3]  ;;  %909 = vmatpush.msra.mxu1 %v858_v3  ;;  %v850_v10 = vld [vmem:[%s2167_s16 + $0x18] sm:$0xff]  ;;  %v848_v11 = vld [vmem:[%s2167_s16 + $0x8] sm:$0xff]  ;;  %s2501_s16 = scalar_lea.vmem %s2445_s7, %s2152_s13 }
 0x163   : > { %v2243_v58 = vld [vmem:[#allocation2 + $0x8] sm:$0xff]  ;;  %v865_v60 = vperm.slane %v863_v59, 0  ;;  %v1840_v13 = vld [vmem:[%s2159_s0 + $0x1] ss:$0 sm:$0xff]  ;;  %v2279_v18 = vld [vmem:[%s2159_s0] ss:$0 sm:$0xff] }
 0x164   : > { %887 = vmatpush.msra.mxu0 %v855_v52  ;;  %910 = vmatpush.msra.mxu1 %v856_v5  ;;  %v866_v22 = vperm.slane %v863_v59, 1  ;;  %v927_v43 = vld [vmem:[%s2178_s3 + $0x18] sm:$0xff]  ;;  %v926_v44 = vld [vmem:[%s2178_s3 + $0x10] sm:$0xff]  ;;  %v925_v45 = vld [vmem:[%s2178_s3 + $0x8] sm:$0xff] }
 0x165   : > { %s2504_s21 = scalar_lea.vmem %s2503_s18, %s2152_s13 }
 0x166   : > { %888 = vmatpush.msra.mxu0 %v853_v53  ;;  %911 = vmatpush.msra.mxu1 %v854_v6  ;;  %s2506_s26 = scalar_lea.vmem %s2505_s20, %s2152_s13 }
 0x168   : > { %889 = vmatpush.msra.mxu0 %v851_v54  ;;  %912 = vmatpush.msra.mxu1 %v852_v9  ;;  %v930_v9 = vld [vmem:[%s2178_s3 + $0x30] sm:$0xff] }
 0x16a   : > { %890 = vmatpush.msra.mxu0 %v849_v55  ;;  %913 = vmatpush.msra.mxu1 %v850_v10  ;;  %v924_v55 = vld [vmem:[%s2178_s3] sm:$0xff]  ;;  %v929_v10 = vld [vmem:[%s2178_s3 + $0x28] sm:$0xff] }
 0x16c   : > { %891 = vmatpush.msra.mxu0 %v847_v56  ;;  %914 = vmatpush.msra.mxu1 %v848_v11 }
 0x16d   : > { %1724 = vmatmul.msk.f32.vlgmr.msra.gmra.mxu0 %vm869_vm8, %v2239_v57  ;;  %1726 = vmatmul.msk.f32.vlgmr.msra.gmra.mxu1 %vm869_vm8, %v2239_v57 }
 0x175   : > { %1725 = vmatmul.msk.f32.gmra.mxu0 %vm869_vm8, %v2243_v58  ;;  %1727 = vmatmul.msk.f32.gmra.mxu1 %vm869_vm8, %v2243_v58 }
 0x1ea   : > { %v893_v61 = vpop.f32.mrf.mxu0  ;;  %v916_v23 = vpop.f32.mrf.mxu1 }
 0x1eb   : > { %v2248_v62 = vadd.f32 %v893_v61, %v865_v60  ;;  %v2283_v24 = vadd.f32 %v916_v23, %v866_v22 }
 0x1ed   : > { %1062 = vrot.lane.b32.xlu2 %v2248_v62, %s1979_s29  ;;  %939 = vrot.lane.b32.xlu0 %v2248_v62, %s1980_s28 }
 0x1f2   : > { %v896_v63 = vpop.f32.mrf.mxu0  ;;  %v919_v25 = vpop.f32.mrf.mxu1 }
 0x1f3   : > { %v897_v0 = vadd.f32 %v896_v63, %v865_v60  ;;  %v920_v26 = vadd.f32 %v919_v25, %v866_v22 }
 0x1f5   : > { %967 = vrot.lane.b32.xlu2 %v897_v0, %s1980_s28  ;;  %1057 = vmatpush.msra.mxu3 %v920_v26 }
 0x1fd   : > { %1092 = vrot.lane.b32.xlu2 %v897_v0, %s1981_s15 }
 0x205   : > { %1090 = vrot.lane.b32.xlu2 %v897_v0, %s1979_s29 }
 0x247   : > { %v2258_v4 = vpop.permute.xlu2 %1062 }
 0x24f   : > { %v968_v7 = vpop.permute.xlu2 %967 }
 0x250   : > { %1730 = vmatpush.xpose.msk.msrb.mxu0 %vm941_vm9, %v968_v7 }
 0x253   : > { %1731 = vmatmul.msk.f32.vlgmr.msrb.gmra.mxu0 %vm941_vm9, %v897_v0 }
 0x257   : > { %v1093_v12 = vpop.permute.xlu2 %1092 }
 0x258   : > { %1736 = vmatpush.xpose.msk.msrb.mxu1 %vm941_vm9, %v1093_v12 }
 0x25c   : > { %1241 = vmatpush.msra.mxu1 %v927_v43 }
 0x25e   : > { %1242 = vmatpush.msra.mxu1 %v926_v44 }
 0x25f   : > { %v940_v8 = vpop.permute.xlu0 %939  ;;  %v1091_v17 = vpop.permute.xlu2 %1090 }
 0x260   : > { %1728 = vmatpush.xpose.msk.msra.mxu2 %vm941_vm9, %v940_v8  ;;  %1737 = vmatmul.msk.f32.vlgmr.msrb.gmra.mxu1 %vm941_vm9, %v1091_v17  ;;  %v931_v8 = vld [vmem:[%s2178_s3 + $0x38] sm:$0xff] }
 0x261   : > { %1243 = vmatpush.msra.mxu1 %v925_v45  ;;  %1212 = vmatpush.msra.mxu0 %v931_v8 }
 0x263   : > { %1729 = vmatmul.msk.f32.vlgmr.msra.gmra.mxu2 %vm941_vm9, %v2248_v62  ;;  %1244 = vmatpush.msra.mxu1 %v924_v55 }
 0x264   : > { %1034 = vmatpush.msrb.mxu2 %v2283_v24  ;;  %1213 = vmatpush.msra.mxu0 %v930_v9 }
 0x266   : > { %1214 = vmatpush.msra.mxu0 %v929_v10  ;;  %v1842_v10 = vld [vmem:[%s2504_s21] ss:$0 sm:$0xff] }
 0x2d0   : > { %v990_v14 = vpop.f32.mrf.mxu0 }
 0x2d1   : > { %v991_v15 = vadd.f32 %v1840_v13, %v990_v14 }
 0x2d3   : > { %v997_v16 = vsel %vm993_vm10, %v991_v15, -inf }
 0x2d4   : > { %998 = vmax.xlane.f32.xlu2 %v997_v16 }
 0x2dd   : > { %v1115_v27 = vpop.f32.mrf.mxu1 }
 0x2de   : > { %v1116_v28 = vadd.f32 %v1840_v13, %v1115_v27 }
 0x2e0   : > { %v1121_v30 = vsel %vm993_vm10, %v1116_v28, -inf }
 0x2e6   : > { %v963_v19 = vpop.f32.mrf.mxu2 }
 0x2e7   : > { %v964_v20 = vadd.f32 %v2279_v18, %v963_v19 }
 0x2e9   : > { %v994_v21 = vsel %vm993_vm10, %v964_v20, -inf }
 0x2ea   : > { %995 = vmax.xlane.f32.xlu0 %v994_v21 }
 0x2f2   : > { %1122 = vmax.xlane.f32.xlu0 %v1121_v30 }
 0x347   : > { %v999_v33 = vpop.xlane.xlu2 %998 }
 0x348   : > { %v1001_v34 = vsub.f32 %v991_v15, %v999_v33  ;;  %v928_v15 = vld [vmem:[%s2178_s3 + $0x20] sm:$0xff]  ;;  %s2502_s3 = sld [smem:[#allocation14_spill]] }
 0x349   : > { %1215 = vmatpush.msra.mxu0 %v928_v15 }
 0x34a   : > { %v1004_v35 = vmul.f32 1.442695, %v1001_v34 }
 0x35d   : > { %v996_v29 = vpop.xlane.xlu0 %995 }
 0x35e   : > { %v1000_v31 = vsub.f32 %v964_v20, %v996_v29 }
 0x360   : > { %v1002_v32 = vmul.f32 1.442695, %v1000_v31  ;;  %v1982_v31 = vmov 64.0  }
 0x362   : > { %1848 = vpow2.f32 %v1002_v32 }
 0x363   : > { %1850 = vpow2.f32 %v1004_v35 }
 0x365   : > { %v1123_v40 = vpop.xlane.xlu0 %1122 }
 0x366   : > { %v1125_v41 = vsub.f32 %v1116_v28, %v1123_v40 }
 0x368   : > { %v1849_v36 = vpop.eup %1848  ;;  %v1128_v42 = vmul.f32 1.442695, %v1125_v41 }
 0x369   : > { %v1006_v37 = vsel %vm993_vm10, %v1849_v36, 0.0  ;;  %v1851_v38 = vpop.eup %1850 }
 0x36a   : > { %1007 = vadd.xlane.f32.xlu1 %v1006_v37  ;;  %v1009_v39 = vsel %vm993_vm10, %v1851_v38, 0.0  ;;  %1852 = vpow2.f32 %v1128_v42 }
 0x36b   : > { %1010 = vadd.xlane.f32.xlu0 %v1009_v39 }
 0x370   : > { %v1853_v46 = vpop.eup %1852 }
 0x371   : > { %v1133_v48 = vsel %vm993_vm10, %v1853_v46, 0.0 }
 0x372   : > { %1134 = vadd.xlane.f32.xlu2 %v1133_v48  ;;  %v1328_v48 = vld [vmem:[%s2502_s3 + $0x28] sm:$0xff] }
 0x383   : > { %1064 = vrot.lane.b32.xlu1 %v2248_v62, %s1981_s15 }
 0x3dd   : > { %v1008_v47 = vpop.xlane.xlu1 %1007 }
 0x3de   : > { %1854 = vrcp.f32 %v1008_v47  ;;  %v1011_v49 = vpop.xlane.xlu0 %1010  ;;  %v1329_v47 = vld [vmem:[%s2502_s3 + $0x30] sm:$0xff] }
 0x3df   : > { %1856 = vrcp.f32 %v1011_v49  ;;  %v1327_v49 = vld [vmem:[%s2502_s3 + $0x20] sm:$0xff] }
 0x3e4   : > { %v1855_v50 = vpop.eup %1854 }
 0x3e5   : > { %v1014_v51 = vmul.f32 %v1855_v50, %v1849_v36  ;;  %v1857_v52 = vpop.eup %1856  ;;  %v1135_v3 = vpop.xlane.xlu2 %1134  ;;  %v1326_v50 = vld [vmem:[%s2502_s3 + $0x18] sm:$0xff] }
 0x3e6   : > { %v1015_v53 = vmul.f32 %v1857_v52, %v1851_v38  ;;  %v1324_v52 = vld [vmem:[%s2502_s3 + $0x8] sm:$0xff] }
 0x3e7   : > { %1732 = vmatmul.msk.f32.vlgmr.msrb.gmra.mxu2 %vm993_vm10, %v1014_v51  ;;  %v1325_v51 = vld [vmem:[%s2502_s3 + $0x10] sm:$0xff] }
 0x3e8   : > { %1733 = vmatmul.msk.f32.vlgmr.msra.gmra.mxu3 %vm993_vm10, %v1015_v53  ;;  %v1323_v53 = vld [vmem:[%s2502_s3] sm:$0xff] }
 0x3f5   : > { %v1065_v54 = vpop.permute.xlu1 %1064 }
 0x3f6   : > { %1734 = vmatpush.xpose.msk.msra.mxu2 %vm941_vm9, %v1065_v54 }
 0x3f9   : > { %1735 = vmatmul.msk.f32.vlgmr.msra.gmra.mxu2 %vm941_vm9, %v2258_v4 }
 0x46a   : > { %v1036_v56 = vpop.f32.mrf.mxu2 }
 0x46b   : > { %1742 = vmatmul.msk.f32.vlgmr.msra.gmra.mxu1 %vm941_vm9, %v1036_v56  ;;  %v1059_v59 = vpop.f32.mrf.mxu3 }
 0x473   : > { %1743 = vmatmul.msk.f32.gmra.mxu1 %vm941_vm9, %v1059_v59  ;;  %v1397_v59 = vld [vmem:[%s2199_s22 + $0x78] sm:$0xff] }
 0x47c   : > { %v1087_v60 = vpop.f32.mrf.mxu2 }
 0x47d   : > { %v1088_v61 = vadd.f32 %v2279_v18, %v1087_v60  ;;  %v1841_v18 = vld [vmem:[%s2501_s16] ss:$0 sm:$0xff]  ;;  %v1396_v60 = vld [vmem:[%s2199_s22 + $0x70] sm:$0xff] }
 0x47f   : > { %v1118_v62 = vsel %vm993_vm10, %v1088_v61, -inf }
 0x480   : > { %1119 = vmax.xlane.f32.xlu1 %v1118_v62 }
 0x499   : > { %1168 = vrot.lane.b32.xlu1 %v920_v26, %s1979_s29 }
 0x4e8   : > { %v1246_v19 = vpop.f32.mrf.mxu1 }
 0x4f0   : > { %v1249_v25 = vpop.f32.mrf.mxu1 }
 0x4f3   : > { %v1120_v63 = vpop.xlane.xlu1 %1119 }
 0x4f4   : > { %v1124_v0 = vsub.f32 %v1088_v61, %v1120_v63  ;;  %v1395_v61 = vld [vmem:[%s2199_s22 + $0x68] sm:$0xff] }
 0x4f6   : > { %v1126_v1 = vmul.f32 1.442695, %v1124_v0  ;;  %v1394_v0 = vld [vmem:[%s2199_s22 + $0x60] sm:$0xff] }
 0x4f8   : > { %1858 = vpow2.f32 %v1126_v1 }
 0x4f9   : > { %1860 = vrcp.f32 %v1135_v3 }
 0x4fe   : > { %v1859_v2 = vpop.eup %1858 }
 0x4ff   : > { %v1130_v4 = vsel %vm993_vm10, %v1859_v2, 0.0  ;;  %v1861_v5 = vpop.eup %1860 }
 0x500   : > { %1131 = vadd.xlane.f32.xlu0 %v1130_v4  ;;  %v1139_v7 = vmul.f32 %v1861_v5, %v1853_v46  ;;  %v1330_v46 = vld [vmem:[%s2502_s3 + $0x38] sm:$0xff] }
 0x50b   : > { %v1169_v6 = vpop.permute.xlu1 %1168 }
 0x50c   : > { %1189 = vmatpush.msrb.mxu3 %v1169_v6 }
 0x50d   : > { %1739 = vmatmul.msk.f32.vlgmr.msrb.gmra.mxu3 %vm993_vm10, %v1139_v7 }
 0x50e   : > { %1402 = vmatpush.msra.mxu3 %v1397_v59 }
 0x510   : > { %1403 = vmatpush.msra.mxu3 %v1396_v60  ;;  %v1845_v60 = vld [vmem:[%s760_s19] ss:$0 sm:$0xff] }
 0x512   : > { %1404 = vmatpush.msra.mxu3 %v1395_v61 }
 0x514   : > { %1141 = vrot.lane.b32.xlu0 %v2283_v24, %s1979_s29  ;;  %1405 = vmatpush.msra.mxu3 %v1394_v0 }
 0x573   : > { %v1132_v11 = vpop.xlane.xlu0 %1131 }
 0x574   : > { %1862 = vrcp.f32 %v1132_v11 }
 0x575   : > { %1864 = vrcp.f32 %v1982_v31  ;;  %v1386_v31 = vld [vmem:[%s2199_s22 + $0x20] sm:$0xff] }
 0x57a   : > { %v1863_v12 = vpop.eup %1862 }
 0x57b   : > { %v1138_v13 = vmul.f32 %v1863_v12, %v1859_v2  ;;  %v1865_v32 = vpop.eup %1864 }
 0x57c   : > { %v1269_v33 = vmul.f32 64.0, %v1865_v32  ;;  %vm1273_vm11 = vweird.f32 %v1865_v32 }
 0x57e   : > { %v1270_v34 = vsub.f32 1.0, %v1269_v33  ;;  %v1384_v33 = vld [vmem:[%s2199_s22 + $0x10] sm:$0xff] }
 0x580   : > { %v1271_v35 = vmul.f32 %v1865_v32, %v1270_v34  ;;  %v1383_v34 = vld [vmem:[%s2199_s22 + $0x8] sm:$0xff] }
 0x586   : > { %v1142_v14 = vpop.permute.xlu0 %1141 }
 0x587   : > { %1162 = vmatpush.msrb.mxu2 %v1142_v14  ;;  %v1843_v14 = vld [vmem:[%s2506_s26] ss:$0 sm:$0xff] }
 0x588   : > { %1738 = vmatmul.msk.f32.vlgmr.msrb.gmra.mxu2 %vm993_vm10, %v1138_v13 }
 0x589   : > { %1349 = vmatpush.msra.mxu2 %v1330_v46 }
 0x58b   : > { %1350 = vmatpush.msra.mxu2 %v1329_v47 }
 0x58d   : > { %1351 = vmatpush.msra.mxu2 %v1328_v48 }
 0x58f   : > { %1352 = vmatpush.msra.mxu2 %v1327_v49 }
 0x590   : > { %v1191_v17 = vpop.f32.mrf.mxu3 }
 0x591   : > { %1353 = vmatpush.msra.mxu2 %v1326_v50 }
 0x593   : > { %1354 = vmatpush.msra.mxu2 %v1325_v51 }
 0x595   : > { %1355 = vmatpush.msra.mxu2 %v1324_v52 }
 0x597   : > { %1356 = vmatpush.msra.mxu2 %v1323_v53 }
 0x60b   : > { %v1164_v16 = vpop.f32.mrf.mxu2 }
 0x60c   : > { %1740 = vmatmul.msk.f32.vlgmr.msra.gmra.mxu0 %vm941_vm9, %v1164_v16 }
 0x614   : > { %1741 = vmatmul.msk.f32.gmra.mxu0 %vm941_vm9, %v1191_v17 }
 0x689   : > { %v1217_v20 = vpop.f32.mrf.mxu0 }
 0x68a   : > { %v1247_v21 = vadd.f32 %v1246_v19, %v1217_v20 }
 0x68c   : > { %v1256_v22 = vadd.f32 %v1841_v18, %v1247_v21 }
 0x68e   : > { %v1258_v23 = vadd.f32 %v1256_v22, %v2239_v57  ;;  %v1272_v57 = vadd.f32 %v1865_v32, %v1271_v35  ;;  %v1382_v35 = vld [vmem:[%s2199_s22] sm:$0xff] }
 0x690   : > { %v1262_v24 = vsel %vm869_vm8, %v1258_v23, 0.0  ;;  %v2326_v36 = vsel %vm1273_vm11, %v1865_v32, %v1272_v57  ;;  %v1385_v32 = vld [vmem:[%s2199_s22 + $0x18] sm:$0xff]  ;;  %v1844_v57 = vld [vmem:[%s2507_s8] ss:$0 sm:$0xff] }
 0x691   : > { %1263 = vadd.xlane.f32.xlu2 %v1262_v24  ;;  %v1220_v26 = vpop.f32.mrf.mxu0  ;;  %v1393_v24 = vld [vmem:[%s2199_s22 + $0x58] sm:$0xff] }
 0x692   : > { %v1250_v27 = vadd.f32 %v1249_v25, %v1220_v26  ;;  %1406 = vmatpush.msra.mxu3 %v1393_v24  ;;  %v1392_v25 = vld [vmem:[%s2199_s22 + $0x50] sm:$0xff]  ;;  %v1391_v26 = vld [vmem:[%s2199_s22 + $0x48] sm:$0xff] }
 0x694   : > { %v1257_v28 = vadd.f32 %v1841_v18, %v1250_v27  ;;  %1407 = vmatpush.msra.mxu3 %v1392_v25  ;;  %v1390_v27 = vld [vmem:[%s2199_s22 + $0x40] sm:$0xff] }
 0x696   : > { %v1259_v29 = vadd.f32 %v1257_v28, %v2243_v58  ;;  %1408 = vmatpush.msra.mxu3 %v1391_v26  ;;  %v1389_v28 = vld [vmem:[%s2199_s22 + $0x38] sm:$0xff] }
 0x698   : > { %v1265_v30 = vsel %vm869_vm8, %v1259_v29, 0.0  ;;  %1409 = vmatpush.msra.mxu3 %v1390_v27 }
 0x699   : > { %1266 = vadd.xlane.f32.xlu2 %v1265_v30  ;;  %v1387_v30 = vld [vmem:[%s2199_s22 + $0x28] sm:$0xff] }
 0x69a   : > { %1410 = vmatpush.msra.mxu3 %v1389_v28 }
 0x704   : > { %v1264_v37 = vpop.xlane.xlu2 %1263 }
 0x705   : > { %v1275_v38 = vmul.f32 %v2326_v36, %v1264_v37 }
 0x707   : > { %v1277_v58 = vsub.f32 %v1258_v23, %v1275_v38 }
 0x709   : > { %v1279_v39 = vmul.f32 %v1277_v58, %v1277_v58 }
 0x70b   : > { %v1281_v40 = vsel %vm869_vm8, %v1279_v39, 0.0 }
 0x70c   : > { %1282 = vadd.xlane.f32.xlu0 %v1281_v40  ;;  %v1267_v41 = vpop.xlane.xlu2 %1266 }
 0x70d   : > { %v1276_v42 = vmul.f32 %v2326_v36, %v1267_v41 }
 0x70f   : > { %v2331_v43 = vsub.f32 %v1259_v29, %v1276_v42  ;;  %v1388_v29 = vld [vmem:[%s2199_s22 + $0x30] sm:$0xff] }
 0x710   : > { %1411 = vmatpush.msra.mxu3 %v1388_v29  ;;  %v1846_v29 = vld [vmem:[%s763_s17] ss:$0 sm:$0xff] }
 0x711   : > { %v1280_v44 = vmul.f32 %v2331_v43, %v2331_v43 }
 0x712   : > { %1412 = vmatpush.msra.mxu3 %v1387_v30 }
 0x713   : > { %v1284_v45 = vsel %vm869_vm8, %v1280_v44, 0.0 }
 0x714   : > { %1285 = vadd.xlane.f32.xlu2 %v1284_v45  ;;  %1413 = vmatpush.msra.mxu3 %v1386_v31  ;;  %v1847_v31 = vld [vmem:[%s766_s10] ss:$0 sm:$0xff] }
 0x716   : > { %1414 = vmatpush.msra.mxu3 %v1385_v32 }
 0x718   : > { %1415 = vmatpush.msra.mxu3 %v1384_v33 }
 0x71a   : > { %1416 = vmatpush.msra.mxu3 %v1383_v34 }
 0x71c   : > { %1417 = vmatpush.msra.mxu3 %v1382_v35 }
 0x77f   : > { %v1283_v54 = vpop.xlane.xlu0 %1282 }
 0x780   : > { %v1287_v55 = vmul.f32 %v1283_v54, %v2326_v36 }
 0x782   : > { %v1289_v56 = vadd.f32 1e-12, %v1287_v55 }
 0x784   : > { %1866 = vrsqrt.f32 %v1289_v56  ;;  %vm1297_vm13 = vweird.f32 %v1289_v56 }
 0x787   : > { %v1286_v62 = vpop.xlane.xlu2 %1285 }
 0x788   : > { %v1288_v63 = vmul.f32 %v1286_v62, %v2326_v36 }
 0x78a   : > { %v1867_v1 = vpop.eup %1866  ;;  %v1290_v2 = vadd.f32 1e-12, %v1288_v63 }
 0x78b   : > { %v1292_v3 = vmul.f32 %v1867_v1, %v1289_v56  ;;  %vm1298_vm12 = vweird.f32 %v1867_v1 }
 0x78c   : > { %1868 = vrsqrt.f32 %v1290_v2  ;;  %vm1299_vm14 = vmor %vm1297_vm13, %vm1298_vm12  ;;  %vm1307_vm0 = vweird.f32 %v1290_v2 }
 0x78d   : > { %v1293_v4 = vmul.f32 %v1867_v1, %v1292_v3 }
 0x78f   : > { %v1294_v5 = vmul.f32 0.5, %v1293_v4 }
 0x791   : > { %v1295_v6 = vsub.f32 1.5, %v1294_v5 }
 0x792   : > { %v1869_v7 = vpop.eup %1868 }
 0x793   : > { %v1296_v8 = vmul.f32 %v1867_v1, %v1295_v6  ;;  %v1302_v9 = vmul.f32 %v1869_v7, %v1290_v2  ;;  %vm1308_vm15 = vweird.f32 %v1869_v7 }
 0x794   : > { %vm1309_vm1 = vmor %vm1307_vm0, %vm1308_vm15 }
 0x795   : > { %v1300_v11 = vsel %vm1299_vm14, %v1867_v1, %v1296_v8  ;;  %v1303_v12 = vmul.f32 %v1869_v7, %v1302_v9 }
 0x796   : > { %v1311_v13 = vmul.f32 %v1300_v11, %v1277_v58 }
 0x797   : > { %v1304_v15 = vmul.f32 0.5, %v1303_v12 }
 0x798   : > { %v1316_v16 = vmul.f32 %v1842_v10, %v1311_v13 }
 0x799   : > { %v1305_v17 = vsub.f32 1.5, %v1304_v15 }
 0x79a   : > { %v2360_v18 = vadd.f32 %v1843_v14, %v1316_v16 }
 0x79b   : > { %v1306_v19 = vmul.f32 %v1869_v7, %v1305_v17 }
 0x79c   : > { %1744 = vmatmul.msk.f32.vlgmr.msra.gmra.mxu2 %vm869_vm8, %v2360_v18 }
 0x79d   : > { %v1310_v20 = vsel %vm1309_vm1, %v1869_v7, %v1306_v19 }
 0x79e   : > { %v1312_v21 = vmul.f32 %v1310_v20, %v2331_v43 }
 0x7a0   : > { %v1317_v22 = vmul.f32 %v1842_v10, %v1312_v21 }
 0x7a2   : > { %v1322_v23 = vadd.f32 %v1843_v14, %v1317_v22 }
 0x7a4   : > { %1745 = vmatmul.msk.f32.gmra.mxu2 %vm869_vm8, %v1322_v23 }
 0x81f   : > { %v1358_v37 = vpop.f32.mrf.mxu2 }
 0x820   : > { %v1359_v38 = vadd.f32 %v1844_v57, %v1358_v37 }
 0x822   : > { %v1366_v58 = vmul.f32 0.044715, %v1359_v38  ;;  %v1364_v51 = vmul.f32 0.5, %v1359_v38 }
 0x824   : > { %v1368_v39 = vmul.f32 %v1366_v58, %v1359_v38 }
 0x826   : > { %v1370_v40 = vmul.f32 %v1368_v39, %v1359_v38 }
 0x827   : > { %v1361_v41 = vpop.f32.mrf.mxu2 }
 0x828   : > { %v1362_v42 = vadd.f32 %v1844_v57, %v1361_v41  ;;  %v1372_v43 = vadd.f32 %v1370_v40, %v1359_v38 }
 0x82a   : > { %v1374_v44 = vmul.f32 0.7978846, %v1372_v43  ;;  %v1367_v45 = vmul.f32 0.044715, %v1362_v42  ;;  %v1365_v55 = vmul.f32 0.5, %v1362_v42 }
 0x82c   : > { %1870 = vtanh.f32 %v1374_v44  ;;  %v1369_v46 = vmul.f32 %v1367_v45, %v1362_v42 }
 0x82e   : > { %v1371_v47 = vmul.f32 %v1369_v46, %v1362_v42 }
 0x830   : > { %v1373_v48 = vadd.f32 %v1371_v47, %v1362_v42 }
 0x832   : > { %v1871_v49 = vpop.eup %1870  ;;  %v1375_v50 = vmul.f32 0.7978846, %v1373_v48 }
 0x833   : > { %v1378_v52 = vadd.f32 1.0, %v1871_v49 }
 0x834   : > { %1872 = vtanh.f32 %v1375_v50 }
 0x835   : > { %v1380_v53 = vmul.f32 %v1378_v52, %v1364_v51 }
 0x837   : > { %1418 = vmatmul.f32.vlgmr.msra.gmra.mxu3 %v1380_v53 }
 0x83a   : > { %v1873_v54 = vpop.eup %1872 }
 0x83b   : > { %v1379_v56 = vadd.f32 1.0, %v1873_v54 }
 0x83d   : > { %v1381_v59 = vmul.f32 %v1379_v56, %v1365_v55 }
 0x83f   : > { %1421 = vmatmul.f32.gmra.mxu3 %v1381_v59 }
 0x8ba   : > { %v1419_v61 = vpop.f32.mrf.mxu3 }
 0x8bb   : > { %v1420_v62 = vadd.f32 %v1845_v60, %v1419_v61 }
 0x8bd   : > { %v1425_v63 = vadd.f32 %v1420_v62, %v2360_v18 }
 0x8bf   : > { %v1429_v0 = vsel %vm869_vm8, %v1425_v63, 0.0 }
 0x8c0   : > { %1430 = vadd.xlane.f32.xlu1 %v1429_v0 }
 0x8c2   : > { %v1422_v1 = vpop.f32.mrf.mxu3 }
 0x8c3   : > { %v1423_v2 = vadd.f32 %v1845_v60, %v1422_v1 }
 0x8c5   : > { %v1426_v3 = vadd.f32 %v1423_v2, %v1322_v23 }
 0x8c7   : > { %v1432_v4 = vsel %vm869_vm8, %v1426_v3, 0.0 }
 0x8c8   : > { %1433 = vadd.xlane.f32.xlu2 %v1432_v4 }
 0x933   : > { %v1431_v5 = vpop.xlane.xlu1 %1430 }
 0x934   : > { %v1435_v6 = vmul.f32 %v1431_v5, %v2326_v36 }
 0x936   : > { %v1437_v7 = vsub.f32 %v1425_v63, %v1435_v6 }
 0x938   : > { %v1439_v8 = vmul.f32 %v1437_v7, %v1437_v7 }
 0x93a   : > { %v1441_v9 = vsel %vm869_vm8, %v1439_v8, 0.0 }
 0x93b   : > { %1442 = vadd.xlane.f32.xlu2 %v1441_v9  ;;  %v1434_v10 = vpop.xlane.xlu2 %1433 }
 0x93c   : > { %v1436_v11 = vmul.f32 %v1434_v10, %v2326_v36 }
 0x93e   : > { %v1438_v12 = vsub.f32 %v1426_v3, %v1436_v11 }
 0x940   : > { %v1440_v13 = vmul.f32 %v1438_v12, %v1438_v12 }
 0x942   : > { %v1444_v14 = vsel %vm869_vm8, %v1440_v13, 0.0 }
 0x943   : > { %1445 = vadd.xlane.f32.xlu2 %v1444_v14 }
 0x9ae   : > { %v1443_v15 = vpop.xlane.xlu2 %1442 }
 0x9af   : > { %v1447_v16 = vmul.f32 %v1443_v15, %v2326_v36 }
 0x9b1   : > { %v1449_v17 = vadd.f32 1e-12, %v1447_v16 }
 0x9b3   : > { %1874 = vrsqrt.f32 %v1449_v17  ;;  %vm1457_vm3 = vweird.f32 %v1449_v17 }
 0x9b6   : > { %v1446_v18 = vpop.xlane.xlu2 %1445 }
 0x9b7   : > { %v1448_v19 = vmul.f32 %v1446_v18, %v2326_v36 }
 0x9b9   : > { %v1875_v20 = vpop.eup %1874  ;;  %v1450_v21 = vadd.f32 1e-12, %v1448_v19 }
 0x9ba   : > { %v1452_v22 = vmul.f32 %v1875_v20, %v1449_v17  ;;  %vm1458_vm2 = vweird.f32 %v1875_v20 }
 0x9bb   : > { %1876 = vrsqrt.f32 %v1450_v21  ;;  %vm1459_vm4 = vmor %vm1457_vm3, %vm1458_vm2  ;;  %vm1467_vm6 = vweird.f32 %v1450_v21 }
 0x9bc   : > { %v1453_v23 = vmul.f32 %v1875_v20, %v1452_v22 }
 0x9be   : > { %v1454_v24 = vmul.f32 0.5, %v1453_v23 }
 0x9c0   : > { %v1455_v25 = vsub.f32 1.5, %v1454_v24 }
 0x9c1   : > { %v1877_v26 = vpop.eup %1876 }
 0x9c2   : > { %v1456_v27 = vmul.f32 %v1875_v20, %v1455_v25  ;;  %v1462_v28 = vmul.f32 %v1877_v26, %v1450_v21  ;;  %vm1468_vm5 = vweird.f32 %v1877_v26 }
 0x9c3   : > { %vm1469_vm7 = vmor %vm1467_vm6, %vm1468_vm5 }
 0x9c4   : > { %v1460_v36 = vsel %vm1459_vm4, %v1875_v20, %v1456_v27  ;;  %v1463_v30 = vmul.f32 %v1877_v26, %v1462_v28 }
 0x9c5   : > { %v1471_v32 = vmul.f32 %v1460_v36, %v1437_v7 }
 0x9c6   : > { %v1464_v33 = vmul.f32 0.5, %v1463_v30 }
 0x9c7   : > { %v1476_v34 = vmul.f32 %v1846_v29, %v1471_v32 }
 0x9c8   : > { %v1465_v35 = vsub.f32 1.5, %v1464_v33 }
 0x9c9   : > { %v1481_v57 = vadd.f32 %v1847_v31, %v1476_v34 }
 0x9ca   : > { %v1466_v37 = vmul.f32 %v1877_v26, %v1465_v35 }
 0x9cb   : > { %1483 = vst.msk [vmem:[#allocation2] sm:$0xff] %vm869_vm8, %v1481_v57 }
 0x9cc   : > { %v1470_v38 = vsel %vm1469_vm7, %v1877_v26, %v1466_v37 }
 0x9cd   : > { %v1472_v58 = vmul.f32 %v1470_v38, %v1438_v12 }
 0x9cf   : > { %v1477_v39 = vmul.f32 %v1846_v29, %v1472_v58  ;;  %1488 = sbr.rel (%p1746_p3) target bundleno = 2518 (0x9d6), region = 96 }
 0x9d1   : > { %v1482_v40 = vadd.f32 %v1847_v31, %v1477_v39 }
 0x9d3   : > { %1484 = vst.msk [vmem:[#allocation2 + $0x8] sm:$0xff] %vm869_vm8, %v1482_v40 }
 0x9d4   : > { %1489 = vst.msk [vmem:[%s2216_s4] sm:$0xff] %vm869_vm8, %v1481_v57 }
 0x9d5   : > { %1490 = vst.msk [vmem:[%s2216_s4 + $0x8] sm:$0xff] %vm869_vm8, %v1482_v40 }
 0x9d6 PF: > { %s2511_s13 = sld [smem:[#allocation10_spill]] }
 0x9d7   : > { %s2512_s21 = sld [smem:[#allocation6_spill]] }
 0x9d8   : > { %s2513_s22 = sld [smem:[#allocation7_spill]] }
 0x9d9   : > { %s2514_s23 = sld [smem:[#allocation13_spill]] }
 0x9da   : > { %s2515_s24 = sld [smem:[#allocation8_spill]] }
 0x9db   : > { %s2516_s25 = sld [smem:[#allocation9_spill]] }
 0x9dc   : > { %s29_s28 = sadd.s32 1, %s2511_s13   ;;  %s2517_s26 = sld [smem:[#allocation11_spill]] }
 0x9dd   : > { %p26_p4 = scmp.ge.s32.totalorder %s29_s28, 6   ;;  %s2518_s27 = sld [smem:[#allocation12_spill]] }
 0x9df   :  { %28 = sbr.rel (!%p26_p4) target bundleno = 20 (0x14), region = 171 }
 0x9e4   :  { %1513 = vsyncpa [#allocation4], 1 }
 0x9e5   :  { %1515 = vsyncpa [#allocation4 + $0x1], 1 }

</bundles_post_ra>
